<compile_context>
chip_gen: v7x
topology: tpu7x:2x2x1
jax: 0.10.0
libtpu: 0.0.40
codegen_flags: <defaults>
</compile_context>

<pallas_src>
import functools

import jax
import jax.numpy as jnp
from jax.experimental import pallas as pl
from jax.experimental.pallas import tpu as pltpu

BN_EPS = 1e-5


# ----------------------------- Pallas kernels ------------------------------

def _accumulate_taps(x_ref, w_ref, taps, tr, wo):
    """sum_taps (shifted NHWC window) @ (Cin, Cout), f32 accumulation."""
    cp = x_ref.shape[-1]
    co = w_ref.shape[-1]
    r0 = pl.multiple_of(pl.program_id(1) * tr, tr)   # first output row of tile
    acc = jnp.zeros((tr * wo, co), jnp.float32)
    for t, (py, px, dy, dx) in enumerate(taps):
        # (tr, wo, cp) window of the resident phase image; unit-stride slices.
        tap = x_ref[0, py, px, pl.ds(r0 + dy, tr), pl.ds(dx, wo), :]
        # Flatten spatial -> matmul rows.  Reshape via f32 (natively 8-tiled),
        # then down-cast so the dot takes the bf16 MXU fast path.
        tap = tap.astype(jnp.float32).reshape(tr * wo, cp).astype(jnp.bfloat16)
        acc = acc + jnp.dot(tap, w_ref[t], preferred_element_type=jnp.float32)
    return acc


def _conv_bn_kernel(x_ref, w_ref, b_ref, o_ref, *, taps, tr, wo, relu):
    acc = _accumulate_taps(x_ref, w_ref, taps, tr, wo)
    y = acc + b_ref[...]                      # BN scale already folded into w
    if relu:
        y = jnp.maximum(y, 0.0)
    o_ref[0] = y.astype(o_ref.dtype)


def _conv_bn_res_relu_kernel(x_ref, w_ref, b_ref, r_ref, o_ref, *, taps, tr, wo):
    acc = _accumulate_taps(x_ref, w_ref, taps, tr, wo)
    y = acc + b_ref[...] + r_ref[0].astype(jnp.float32)
    o_ref[0] = jnp.maximum(y, 0.0).astype(o_ref.dtype)


# ------------------------------ helpers -------------------------------------

def _round_up(x, m):
    return ((x + m - 1) // m) * m


def _pad_channels(c):
    # Lane-friendly channel padding: full 128-lane multiples for real stages,
    # sublane (8) multiples for tiny toy channel counts.
    return _round_up(c, 128) if c >= 64 else _round_up(c, 8)


def _pick_row_tile(ho, wo, target_rows=512):
    """Largest legal output-row tile with ~<=512 spatial positions per step."""
    if ho * wo <= target_rows:
        return ho
    cands = [t for t in range(1, ho)
             if ho % t == 0 and (t * wo) % 8 == 0 and t * wo <= target_rows]
    return max(cands) if cands else ho


def make_taps(k, stride):
    """(phase_y, phase_x, row_offset, col_offset) per conv tap, ky-major."""
    return tuple((ky % stride, kx % stride, ky // stride, kx // stride)
                 for ky in range(k) for kx in range(k))


def prepare_input(x_nhwc, pad, stride, cin_pad):
    """Pad NHWC spatially, zero-pad channels, phase-decompose by `stride`.

    Returns (B, stride, stride, Hq, Wq, cin_pad) bf16 with
    out[b, p, q, h, w, c] == x_padded[b, stride*h + p, stride*w + q, c].
    Total size ~= input size (no 9x im2col inflation).
    """
    B, H, W, C = x_nhwc.shape
    x = jnp.pad(x_nhwc, ((0, 0), (pad, pad), (pad, pad), (0, cin_pad - C)))
    hp, wp = H + 2 * pad, W + 2 * pad
    hq, wq = -(-hp // stride), -(-wp // stride)
    x = jnp.pad(x, ((0, 0), (0, hq * stride - hp), (0, wq * stride - wp), (0, 0)))
    x = x.reshape(B, hq, stride, wq, stride, cin_pad)
    x = jnp.transpose(x, (0, 2, 4, 1, 3, 5))
    return x.astype(jnp.bfloat16)


def fold_bn(bn):
    scale = bn["gamma"] / jnp.sqrt(bn["var"] + BN_EPS)
    bias = bn["beta"] - bn["mean"] * scale
    return scale, bias


def prep_weights(w_oihw, scale, cin_pad, cout_pad):
    """(Cout,Cin,KH,KW) torch weight -> (KH*KW, cin_pad, cout_pad) bf16, BN scale folded."""
    cout, cin, kh, kw = w_oihw.shape
    w = jnp.transpose(w_oihw, (2, 3, 1, 0)).reshape(kh * kw, cin, cout)
    w = w * scale[None, None, :]                     # fold BN scale (f32)
    w = jnp.pad(w, ((0, 0), (0, cin_pad - cin), (0, cout_pad - cout)))
    return w.astype(jnp.bfloat16)


def prep_bias(bias, cout_pad):
    cout = bias.shape[0]
    return jnp.pad(bias, (0, cout_pad - cout)).reshape(1, cout_pad).astype(jnp.float32)


# --------------------------- pallas_call wrapper -----------------------------

def fused_conv_bn(xph, w_taps, bias, *, ho, wo, taps, residual=None, relu=True,
                  out_dtype=jnp.bfloat16):
    """Fused conv (in-kernel taps) + folded-BN bias [+ residual] [+ ReLU]."""
    B, s, _, hq, wq, cp = xph.shape
    T, _, co = w_taps.shape
    tr = _pick_row_tile(ho, wo)
    assert ho % tr == 0
    rt = ho // tr
    P = ho * wo

    in_specs = [
        # Whole (phase-decomposed) image per batch element; index map ignores
        # the row-tile axis so the block stays resident across it.
        pl.BlockSpec((1, s, s, hq, wq, cp), lambda b, r: (b, 0, 0, 0, 0, 0)),
        pl.BlockSpec((T, cp, co), lambda b, r: (0, 0, 0)),   # resident weights
        pl.BlockSpec((1, co), lambda b, r: (0, 0)),          # resident bias
    ]
    args = [xph, w_taps, bias]
    if residual is not None:
        in_specs.append(pl.BlockSpec((1, tr * wo, co), lambda b, r: (b, r, 0)))
        args.append(residual)
        kernel = functools.partial(_conv_bn_res_relu_kernel, taps=taps, tr=tr, wo=wo)
    else:
        kernel = functools.partial(_conv_bn_kernel, taps=taps, tr=tr, wo=wo, relu=relu)

    res_bytes = residual.size * residual.dtype.itemsize if residual is not None else 0
    cost = pl.CostEstimate(
        flops=int(2 * B * P * T * cp * co),
        transcendentals=0,
        bytes_accessed=int(xph.size * xph.dtype.itemsize
                           + w_taps.size * w_taps.dtype.itemsize
                           + bias.size * bias.dtype.itemsize
                           + B * P * co * jnp.dtype(out_dtype).itemsize
                           + res_bytes),
    )

    return pl.pallas_call(
        kernel,
        out_shape=jax.ShapeDtypeStruct((B, P, co), out_dtype),
        grid_spec=pltpu.PrefetchScalarGridSpec(
            num_scalar_prefetch=0,
            grid=(B, rt),
            in_specs=in_specs,
            out_specs=pl.BlockSpec((1, tr * wo, co), lambda b, r: (b, r, 0)),
        ),
        compiler_params=pltpu.CompilerParams(
            dimension_semantics=("parallel", "parallel"),
            vmem_limit_bytes=48 * 1024 * 1024,
        ),
        cost_estimate=cost,
    )(*args)


# ------------------------------ forward pass ---------------------------------

def basic_block_forward(x_nchw, params, stride):
    """Pallas-backed BasicBlock forward.  Input/output are NCHW (PyTorch)."""
    x = jnp.transpose(x_nchw, (0, 2, 3, 1))             # -> NHWC
    B, H, W, cin = x.shape
    cout = params["w1"].shape[0]
    cin_p = _pad_channels(cin)
    cout_p = _pad_channels(cout)

    ho = (H + 2 - 3) // stride + 1
    wo = (W + 2 - 3) // stride + 1

    # conv1 -> bn1 -> relu (fused)
    s1, b1 = fold_bn(params["bn1"])
    out1 = fused_conv_bn(
        prepare_input(x, pad=1, stride=stride, cin_pad=cin_p),
        prep_weights(params["w1"], s1, cin_p, cout_p),
        prep_bias(b1, cout_p),
        ho=ho, wo=wo, taps=make_taps(3, stride),
        relu=True, out_dtype=jnp.bfloat16)               # (B, ho*wo, cout_p) bf16

    # shortcut branch
    if stride != 1 or cin != cout:
        ss, bs = fold_bn(params["bns"])
        shortcut = fused_conv_bn(
            prepare_input(x, pad=0, stride=stride, cin_pad=cin_p),
            prep_weights(params["ws"], ss, cin_p, cout_p),
            prep_bias(bs, cout_p),
            ho=ho, wo=wo, taps=make_taps(1, stride),
            relu=False, out_dtype=jnp.bfloat16)          # (B, ho*wo, cout_p) bf16
    else:
        x_id = jnp.pad(x, ((0, 0), (0, 0), (0, 0), (0, cout_p - cin)))
        shortcut = x_id.reshape(B, H * W, cout_p).astype(jnp.bfloat16)

    # conv2 -> bn2 -> += shortcut -> relu (all fused)
    s2, b2 = fold_bn(params["bn2"])
    out = fused_conv_bn(
        prepare_input(out1.reshape(B, ho, wo, cout_p), pad=1, stride=1, cin_pad=cout_p),
        prep_weights(params["w2"], s2, cout_p, cout_p),
        prep_bias(b2, cout_p),
        ho=ho, wo=wo, taps=make_taps(3, 1),
        residual=shortcut, out_dtype=jnp.float32)        # (B, ho*wo, cout_p) f32

    out = out.reshape(B, ho, wo, cout_p)[:, :, :, :cout]
    return jnp.transpose(out, (0, 3, 1, 2))              # -> NCHW


# -------------------------- pure-JAX reference ------------------------------

def _conv2d_ref(x_nchw, w_oihw, stride, padding):
    return jax.lax.conv_general_dilated(
        x_nchw, w_oihw, (stride, stride),
        ((padding, padding), (padding, padding)),
        dimension_numbers=("NCHW", "OIHW", "NCHW"))


def _bn_ref(x, bn):
    g = bn["gamma"][None, :, None, None]
    b = bn["beta"][None, :, None, None]
    m = bn["mean"][None, :, None, None]
    v = bn["var"][None, :, None, None]
    return (x - m) / jnp.sqrt(v + BN_EPS) * g + b


def basic_block_ref(x, params, stride):
    cin = x.shape[1]
    cout = params["w1"].shape[0]
    out = jax.nn.relu(_bn_ref(_conv2d_ref(x, params["w1"], stride, 1), params["bn1"]))
    out = _bn_ref(_conv2d_ref(out, params["w2"], 1, 1), params["bn2"])
    if stride != 1 or cin != cout:
        sc = _bn_ref(_conv2d_ref(x, params["ws"], stride, 0), params["bns"])
    else:
        sc = x
    return jax.nn.relu(out + sc)


# --------------------------------- main -------------------------------------

def make_params(key, cin, cout):
    ks = jax.random.split(key, 12)

    def bn_params(k0, k1, k2, k3, c):
        return {
            "gamma": 1.0 + 0.1 * jax.random.normal(k0, (c,), jnp.float32),
            "beta": 0.1 * jax.random.normal(k1, (c,), jnp.float32),
            "mean": 0.1 * jax.random.normal(k2, (c,), jnp.float32),
            "var": jax.random.uniform(k3, (c,), jnp.float32, 0.5, 1.5),
        }

    return {
        "w1": 0.2 * jax.random.normal(ks[0], (cout, cin, 3, 3), jnp.float32),
        "bn1": bn_params(ks[1], ks[2], ks[3], ks[4], cout),
        "w2": 0.2 * jax.random.normal(ks[5], (cout, cout, 3, 3), jnp.float32),
        "bn2": bn_params(ks[6], ks[7], ks[8], ks[9], cout),
        "ws": 0.2 * jax.random.normal(ks[10], (cout, cin, 1, 1), jnp.float32),
        "bns": bn_params(ks[11], ks[1], ks[5], ks[10], cout),
    }


if __name__ == "__main__":
    key = jax.random.PRNGKey(0)
    k_x, k_p = jax.random.split(key)

    B, Cin, H, W = 2, 4, 16, 16
    Cout, stride = 8, 2   # exercises the 1x1-conv + BN shortcut path

    x = jax.random.normal(k_x, (B, Cin, H, W), jnp.float32)
    params = make_params(k_p, Cin, Cout)

    fwd = jax.jit(basic_block_forward, static_argnames=("stride",))
    out = jax.block_until_ready(fwd(x, params, stride=stride))

    ref = jax.block_until_ready(basic_block_ref(x, params, stride))
    assert out.shape == ref.shape == (B, Cout, H // stride, W // stride)
    # bf16 MXU inputs + f32 accumulation -> compare against the f32 reference
    # with a bf16-appropriate tolerance.
    assert jnp.allclose(out, ref, atol=7e-2, rtol=7e-2), "mismatch vs. reference"

    print("KERNEL_OK")
</pallas_src>

<mosaic_0001>
module attributes {stable_mosaic.version = 11 : i64} {
  func.func @_conv_bn_kernel(%arg0: i32, %arg1: i32, %arg2: memref<1x2x2x9x9x8xbf16, #tpu.memory_space<vmem>>, %arg3: memref<9x8x8xbf16, #tpu.memory_space<vmem>>, %arg4: memref<1x8xf32, #tpu.memory_space<vmem>>, %arg5: memref<1x64x8xbf16, #tpu.memory_space<vmem>>) attributes {dimension_semantics = [#tpu.dimension_semantics<parallel>, #tpu.dimension_semantics<parallel>], iteration_bounds = array<i64: 2, 1>, scalar_prefetch = 0 : i64, scratch_operands = 0 : i64, tpu.core_type = #tpu.core_type<tc>, window_params = [{transform_indices = @transform_0, window_bounds = array<i64: 1, 2, 2, 9, 9, 8>}, {pipeline_mode = #tpu.pipeline_mode<synchronous>, transform_indices = @transform_1, window_bounds = array<i64: 9, 8, 8>}, {pipeline_mode = #tpu.pipeline_mode<synchronous>, transform_indices = @transform_2, window_bounds = array<i64: 1, 8>}, {transform_indices = @transform_3, window_bounds = array<i64: 1, 64, 8>}]} {
    %c8_i32 = arith.constant 8 : i32
    %0 = arith.muli %arg1, %c8_i32 : i32
    %1 = tpu.assume_multiple %0, 8 : i32
    %cst = arith.constant 0.000000e+00 : f32
    %2 = vector.broadcast %cst : f32 to vector<64x8xf32>
    %c0_i32 = arith.constant 0 : i32
    %3 = arith.addi %1, %c0_i32 : i32
    %c0 = arith.constant 0 : index
    %c0_0 = arith.constant 0 : index
    %c0_1 = arith.constant 0 : index
    %4 = arith.index_cast %3 : i32 to index
    %c0_2 = arith.constant 0 : index
    %c0_3 = arith.constant 0 : index
    %5 = vector.load %arg2[%c0, %c0_0, %c0_1, %4, %c0_2, %c0_3] : memref<1x2x2x9x9x8xbf16, #tpu.memory_space<vmem>>, vector<1x1x1x8x8x8xbf16>
    %6 = vector.shape_cast %5 : vector<1x1x1x8x8x8xbf16> to vector<8x8x8xbf16>
    %7 = arith.extf %6 : vector<8x8x8xbf16> to vector<8x8x8xf32>
    %8 = vector.shape_cast %7 : vector<8x8x8xf32> to vector<64x8xf32>
    %9 = arith.truncf %8 : vector<64x8xf32> to vector<64x8xbf16>
    %c0_4 = arith.constant 0 : index
    %c0_5 = arith.constant 0 : index
    %c0_6 = arith.constant 0 : index
    %10 = vector.load %arg3[%c0_4, %c0_5, %c0_6] : memref<9x8x8xbf16, #tpu.memory_space<vmem>>, vector<1x8x8xbf16>
    %11 = vector.shape_cast %10 : vector<1x8x8xbf16> to vector<8x8xbf16>
    %cst_7 = arith.constant dense<0.000000e+00> : vector<64x8xf32>
    %12 = tpu.matmul %9, %11, %cst_7 {dimension_numbers = #tpu.dot_dimension_numbers<[1], [0], [0], [1], [0, 0, 1, 1], [], []>} : vector<64x8xbf16>, vector<8x8xbf16>, vector<64x8xf32> -> vector<64x8xf32>
    %13 = arith.addf %2, %12 : vector<64x8xf32>
    %c0_i32_8 = arith.constant 0 : i32
    %14 = arith.addi %1, %c0_i32_8 : i32
    %c0_9 = arith.constant 0 : index
    %c0_10 = arith.constant 0 : index
    %c1 = arith.constant 1 : index
    %15 = arith.index_cast %14 : i32 to index
    %c0_11 = arith.constant 0 : index
    %c0_12 = arith.constant 0 : index
    %16 = vector.load %arg2[%c0_9, %c0_10, %c1, %15, %c0_11, %c0_12] : memref<1x2x2x9x9x8xbf16, #tpu.memory_space<vmem>>, vector<1x1x1x8x8x8xbf16>
    %17 = vector.shape_cast %16 : vector<1x1x1x8x8x8xbf16> to vector<8x8x8xbf16>
    %18 = arith.extf %17 : vector<8x8x8xbf16> to vector<8x8x8xf32>
    %19 = vector.shape_cast %18 : vector<8x8x8xf32> to vector<64x8xf32>
    %20 = arith.truncf %19 : vector<64x8xf32> to vector<64x8xbf16>
    %c1_13 = arith.constant 1 : index
    %c0_14 = arith.constant 0 : index
    %c0_15 = arith.constant 0 : index
    %21 = vector.load %arg3[%c1_13, %c0_14, %c0_15] : memref<9x8x8xbf16, #tpu.memory_space<vmem>>, vector<1x8x8xbf16>
    %22 = vector.shape_cast %21 : vector<1x8x8xbf16> to vector<8x8xbf16>
    %cst_16 = arith.constant dense<0.000000e+00> : vector<64x8xf32>
    %23 = tpu.matmul %20, %22, %cst_16 {dimension_numbers = #tpu.dot_dimension_numbers<[1], [0], [0], [1], [0, 0, 1, 1], [], []>} : vector<64x8xbf16>, vector<8x8xbf16>, vector<64x8xf32> -> vector<64x8xf32>
    %24 = arith.addf %13, %23 : vector<64x8xf32>
    %c0_i32_17 = arith.constant 0 : i32
    %25 = arith.addi %1, %c0_i32_17 : i32
    %c0_18 = arith.constant 0 : index
    %c0_19 = arith.constant 0 : index
    %c0_20 = arith.constant 0 : index
    %26 = arith.index_cast %25 : i32 to index
    %c1_21 = arith.constant 1 : index
    %c0_22 = arith.constant 0 : index
    %27 = vector.load %arg2[%c0_18, %c0_19, %c0_20, %26, %c1_21, %c0_22] : memref<1x2x2x9x9x8xbf16, #tpu.memory_space<vmem>>, vector<1x1x1x8x8x8xbf16>
    %28 = vector.shape_cast %27 : vector<1x1x1x8x8x8xbf16> to vector<8x8x8xbf16>
    %29 = arith.extf %28 : vector<8x8x8xbf16> to vector<8x8x8xf32>
    %30 = vector.shape_cast %29 : vector<8x8x8xf32> to vector<64x8xf32>
    %31 = arith.truncf %30 : vector<64x8xf32> to vector<64x8xbf16>
    %c2 = arith.constant 2 : index
    %c0_23 = arith.constant 0 : index
    %c0_24 = arith.constant 0 : index
    %32 = vector.load %arg3[%c2, %c0_23, %c0_24] : memref<9x8x8xbf16, #tpu.memory_space<vmem>>, vector<1x8x8xbf16>
    %33 = vector.shape_cast %32 : vector<1x8x8xbf16> to vector<8x8xbf16>
    %cst_25 = arith.constant dense<0.000000e+00> : vector<64x8xf32>
    %34 = tpu.matmul %31, %33, %cst_25 {dimension_numbers = #tpu.dot_dimension_numbers<[1], [0], [0], [1], [0, 0, 1, 1], [], []>} : vector<64x8xbf16>, vector<8x8xbf16>, vector<64x8xf32> -> vector<64x8xf32>
    %35 = arith.addf %24, %34 : vector<64x8xf32>
    %c0_i32_26 = arith.constant 0 : i32
    %36 = arith.addi %1, %c0_i32_26 : i32
    %c0_27 = arith.constant 0 : index
    %c1_28 = arith.constant 1 : index
    %c0_29 = arith.constant 0 : index
    %37 = arith.index_cast %36 : i32 to index
    %c0_30 = arith.constant 0 : index
    %c0_31 = arith.constant 0 : index
    %38 = vector.load %arg2[%c0_27, %c1_28, %c0_29, %37, %c0_30, %c0_31] : memref<1x2x2x9x9x8xbf16, #tpu.memory_space<vmem>>, vector<1x1x1x8x8x8xbf16>
    %39 = vector.shape_cast %38 : vector<1x1x1x8x8x8xbf16> to vector<8x8x8xbf16>
    %40 = arith.extf %39 : vector<8x8x8xbf16> to vector<8x8x8xf32>
    %41 = vector.shape_cast %40 : vector<8x8x8xf32> to vector<64x8xf32>
    %42 = arith.truncf %41 : vector<64x8xf32> to vector<64x8xbf16>
    %c3 = arith.constant 3 : index
    %c0_32 = arith.constant 0 : index
    %c0_33 = arith.constant 0 : index
    %43 = vector.load %arg3[%c3, %c0_32, %c0_33] : memref<9x8x8xbf16, #tpu.memory_space<vmem>>, vector<1x8x8xbf16>
    %44 = vector.shape_cast %43 : vector<1x8x8xbf16> to vector<8x8xbf16>
    %cst_34 = arith.constant dense<0.000000e+00> : vector<64x8xf32>
    %45 = tpu.matmul %42, %44, %cst_34 {dimension_numbers = #tpu.dot_dimension_numbers<[1], [0], [0], [1], [0, 0, 1, 1], [], []>} : vector<64x8xbf16>, vector<8x8xbf16>, vector<64x8xf32> -> vector<64x8xf32>
    %46 = arith.addf %35, %45 : vector<64x8xf32>
    %c0_i32_35 = arith.constant 0 : i32
    %47 = arith.addi %1, %c0_i32_35 : i32
    %c0_36 = arith.constant 0 : index
    %c1_37 = arith.constant 1 : index
    %c1_38 = arith.constant 1 : index
    %48 = arith.index_cast %47 : i32 to index
    %c0_39 = arith.constant 0 : index
    %c0_40 = arith.constant 0 : index
    %49 = vector.load %arg2[%c0_36, %c1_37, %c1_38, %48, %c0_39, %c0_40] : memref<1x2x2x9x9x8xbf16, #tpu.memory_space<vmem>>, vector<1x1x1x8x8x8xbf16>
    %50 = vector.shape_cast %49 : vector<1x1x1x8x8x8xbf16> to vector<8x8x8xbf16>
    %51 = arith.extf %50 : vector<8x8x8xbf16> to vector<8x8x8xf32>
    %52 = vector.shape_cast %51 : vector<8x8x8xf32> to vector<64x8xf32>
    %53 = arith.truncf %52 : vector<64x8xf32> to vector<64x8xbf16>
    %c4 = arith.constant 4 : index
    %c0_41 = arith.constant 0 : index
    %c0_42 = arith.constant 0 : index
    %54 = vector.load %arg3[%c4, %c0_41, %c0_42] : memref<9x8x8xbf16, #tpu.memory_space<vmem>>, vector<1x8x8xbf16>
    %55 = vector.shape_cast %54 : vector<1x8x8xbf16> to vector<8x8xbf16>
    %cst_43 = arith.constant dense<0.000000e+00> : vector<64x8xf32>
    %56 = tpu.matmul %53, %55, %cst_43 {dimension_numbers = #tpu.dot_dimension_numbers<[1], [0], [0], [1], [0, 0, 1, 1], [], []>} : vector<64x8xbf16>, vector<8x8xbf16>, vector<64x8xf32> -> vector<64x8xf32>
    %57 = arith.addf %46, %56 : vector<64x8xf32>
    %c0_i32_44 = arith.constant 0 : i32
    %58 = arith.addi %1, %c0_i32_44 : i32
    %c0_45 = arith.constant 0 : index
    %c1_46 = arith.constant 1 : index
    %c0_47 = arith.constant 0 : index
    %59 = arith.index_cast %58 : i32 to index
    %c1_48 = arith.constant 1 : index
    %c0_49 = arith.constant 0 : index
    %60 = vector.load %arg2[%c0_45, %c1_46, %c0_47, %59, %c1_48, %c0_49] : memref<1x2x2x9x9x8xbf16, #tpu.memory_space<vmem>>, vector<1x1x1x8x8x8xbf16>
    %61 = vector.shape_cast %60 : vector<1x1x1x8x8x8xbf16> to vector<8x8x8xbf16>
    %62 = arith.extf %61 : vector<8x8x8xbf16> to vector<8x8x8xf32>
    %63 = vector.shape_cast %62 : vector<8x8x8xf32> to vector<64x8xf32>
    %64 = arith.truncf %63 : vector<64x8xf32> to vector<64x8xbf16>
    %c5 = arith.constant 5 : index
    %c0_50 = arith.constant 0 : index
    %c0_51 = arith.constant 0 : index
    %65 = vector.load %arg3[%c5, %c0_50, %c0_51] : memref<9x8x8xbf16, #tpu.memory_space<vmem>>, vector<1x8x8xbf16>
    %66 = vector.shape_cast %65 : vector<1x8x8xbf16> to vector<8x8xbf16>
    %cst_52 = arith.constant dense<0.000000e+00> : vector<64x8xf32>
    %67 = tpu.matmul %64, %66, %cst_52 {dimension_numbers = #tpu.dot_dimension_numbers<[1], [0], [0], [1], [0, 0, 1, 1], [], []>} : vector<64x8xbf16>, vector<8x8xbf16>, vector<64x8xf32> -> vector<64x8xf32>
    %68 = arith.addf %57, %67 : vector<64x8xf32>
    %c1_i32 = arith.constant 1 : i32
    %69 = arith.addi %1, %c1_i32 : i32
    %c0_53 = arith.constant 0 : index
    %c0_54 = arith.constant 0 : index
    %c0_55 = arith.constant 0 : index
    %70 = arith.index_cast %69 : i32 to index
    %c0_56 = arith.constant 0 : index
    %c0_57 = arith.constant 0 : index
    %71 = vector.load %arg2[%c0_53, %c0_54, %c0_55, %70, %c0_56, %c0_57] : memref<1x2x2x9x9x8xbf16, #tpu.memory_space<vmem>>, vector<1x1x1x8x8x8xbf16>
    %72 = vector.shape_cast %71 : vector<1x1x1x8x8x8xbf16> to vector<8x8x8xbf16>
    %73 = arith.extf %72 : vector<8x8x8xbf16> to vector<8x8x8xf32>
    %74 = vector.shape_cast %73 : vector<8x8x8xf32> to vector<64x8xf32>
    %75 = arith.truncf %74 : vector<64x8xf32> to vector<64x8xbf16>
    %c6 = arith.constant 6 : index
    %c0_58 = arith.constant 0 : index
    %c0_59 = arith.constant 0 : index
    %76 = vector.load %arg3[%c6, %c0_58, %c0_59] : memref<9x8x8xbf16, #tpu.memory_space<vmem>>, vector<1x8x8xbf16>
    %77 = vector.shape_cast %76 : vector<1x8x8xbf16> to vector<8x8xbf16>
    %cst_60 = arith.constant dense<0.000000e+00> : vector<64x8xf32>
    %78 = tpu.matmul %75, %77, %cst_60 {dimension_numbers = #tpu.dot_dimension_numbers<[1], [0], [0], [1], [0, 0, 1, 1], [], []>} : vector<64x8xbf16>, vector<8x8xbf16>, vector<64x8xf32> -> vector<64x8xf32>
    %79 = arith.addf %68, %78 : vector<64x8xf32>
    %c1_i32_61 = arith.constant 1 : i32
    %80 = arith.addi %1, %c1_i32_61 : i32
    %c0_62 = arith.constant 0 : index
    %c0_63 = arith.constant 0 : index
    %c1_64 = arith.constant 1 : index
    %81 = arith.index_cast %80 : i32 to index
    %c0_65 = arith.constant 0 : index
    %c0_66 = arith.constant 0 : index
    %82 = vector.load %arg2[%c0_62, %c0_63, %c1_64, %81, %c0_65, %c0_66] : memref<1x2x2x9x9x8xbf16, #tpu.memory_space<vmem>>, vector<1x1x1x8x8x8xbf16>
    %83 = vector.shape_cast %82 : vector<1x1x1x8x8x8xbf16> to vector<8x8x8xbf16>
    %84 = arith.extf %83 : vector<8x8x8xbf16> to vector<8x8x8xf32>
    %85 = vector.shape_cast %84 : vector<8x8x8xf32> to vector<64x8xf32>
    %86 = arith.truncf %85 : vector<64x8xf32> to vector<64x8xbf16>
    %c7 = arith.constant 7 : index
    %c0_67 = arith.constant 0 : index
    %c0_68 = arith.constant 0 : index
    %87 = vector.load %arg3[%c7, %c0_67, %c0_68] : memref<9x8x8xbf16, #tpu.memory_space<vmem>>, vector<1x8x8xbf16>
    %88 = vector.shape_cast %87 : vector<1x8x8xbf16> to vector<8x8xbf16>
    %cst_69 = arith.constant dense<0.000000e+00> : vector<64x8xf32>
    %89 = tpu.matmul %86, %88, %cst_69 {dimension_numbers = #tpu.dot_dimension_numbers<[1], [0], [0], [1], [0, 0, 1, 1], [], []>} : vector<64x8xbf16>, vector<8x8xbf16>, vector<64x8xf32> -> vector<64x8xf32>
    %90 = arith.addf %79, %89 : vector<64x8xf32>
    %c1_i32_70 = arith.constant 1 : i32
    %91 = arith.addi %1, %c1_i32_70 : i32
    %c0_71 = arith.constant 0 : index
    %c0_72 = arith.constant 0 : index
    %c0_73 = arith.constant 0 : index
    %92 = arith.index_cast %91 : i32 to index
    %c1_74 = arith.constant 1 : index
    %c0_75 = arith.constant 0 : index
    %93 = vector.load %arg2[%c0_71, %c0_72, %c0_73, %92, %c1_74, %c0_75] : memref<1x2x2x9x9x8xbf16, #tpu.memory_space<vmem>>, vector<1x1x1x8x8x8xbf16>
    %94 = vector.shape_cast %93 : vector<1x1x1x8x8x8xbf16> to vector<8x8x8xbf16>
    %95 = arith.extf %94 : vector<8x8x8xbf16> to vector<8x8x8xf32>
    %96 = vector.shape_cast %95 : vector<8x8x8xf32> to vector<64x8xf32>
    %97 = arith.truncf %96 : vector<64x8xf32> to vector<64x8xbf16>
    %c8 = arith.constant 8 : index
    %c0_76 = arith.constant 0 : index
    %c0_77 = arith.constant 0 : index
    %98 = vector.load %arg3[%c8, %c0_76, %c0_77] : memref<9x8x8xbf16, #tpu.memory_space<vmem>>, vector<1x8x8xbf16>
    %99 = vector.shape_cast %98 : vector<1x8x8xbf16> to vector<8x8xbf16>
    %cst_78 = arith.constant dense<0.000000e+00> : vector<64x8xf32>
    %100 = tpu.matmul %97, %99, %cst_78 {dimension_numbers = #tpu.dot_dimension_numbers<[1], [0], [0], [1], [0, 0, 1, 1], [], []>} : vector<64x8xbf16>, vector<8x8xbf16>, vector<64x8xf32> -> vector<64x8xf32>
    %101 = arith.addf %90, %100 : vector<64x8xf32>
    %c0_79 = arith.constant 0 : index
    %c0_80 = arith.constant 0 : index
    %102 = vector.load %arg4[%c0_79, %c0_80] : memref<1x8xf32, #tpu.memory_space<vmem>>, vector<1x8xf32>
    %103 = vector.broadcast %102 : vector<1x8xf32> to vector<64x8xf32>
    %104 = arith.addf %101, %103 : vector<64x8xf32>
    %cst_81 = arith.constant 0.000000e+00 : f32
    %105 = vector.broadcast %cst_81 : f32 to vector<64x8xf32>
    %106 = arith.maximumf %104, %105 : vector<64x8xf32>
    %107 = arith.truncf %106 : vector<64x8xf32> to vector<64x8xbf16>
    %c0_82 = arith.constant 0 : index
    %c0_83 = arith.constant 0 : index
    %c0_84 = arith.constant 0 : index
    %108 = vector.load %arg5[%c0_82, %c0_83, %c0_84] : memref<1x64x8xbf16, #tpu.memory_space<vmem>>, vector<1x64x8xbf16>
    %109 = vector.shape_cast %108 : vector<1x64x8xbf16> to vector<64x8xbf16>
    %110 = vector.shape_cast %107 : vector<64x8xbf16> to vector<1x64x8xbf16>
    tpu.vector_store %arg5[%c0_82, %c0_83, %c0_84], %110 {strides = array<i32>} : memref<1x64x8xbf16, #tpu.memory_space<vmem>>, vector<1x64x8xbf16>,
    return
  }
  func.func @transform_0(%arg0: i32, %arg1: i32) -> (i32, i32, i32, i32, i32, i32) {
    %c0_i32 = arith.constant 0 : i32
    %c0_i32_0 = arith.constant 0 : i32
    %c0_i32_1 = arith.constant 0 : i32
    %c0_i32_2 = arith.constant 0 : i32
    %c0_i32_3 = arith.constant 0 : i32
    %c0_i32_4 = arith.constant 0 : i32
    return %arg0, %c0_i32, %c0_i32_0, %c0_i32_1, %c0_i32_2, %c0_i32_3 : i32, i32, i32, i32, i32, i32
  }
  func.func @transform_1(%arg0: i32, %arg1: i32) -> (i32, i32, i32) {
    %c0_i32 = arith.constant 0 : i32
    %c0_i32_0 = arith.constant 0 : i32
    %c0_i32_1 = arith.constant 0 : i32
    %c0_i32_2 = arith.constant 0 : i32
    return %c0_i32, %c0_i32_0, %c0_i32_1 : i32, i32, i32
  }
  func.func @transform_2(%arg0: i32, %arg1: i32) -> (i32, i32) {
    %c0_i32 = arith.constant 0 : i32
    %c0_i32_0 = arith.constant 0 : i32
    %c0_i32_1 = arith.constant 0 : i32
    return %c0_i32, %c0_i32_0 : i32, i32
  }
  func.func @transform_3(%arg0: i32, %arg1: i32) -> (i32, i32, i32) {
    %c0_i32 = arith.constant 0 : i32
    %c0_i32_0 = arith.constant 0 : i32
    return %arg0, %arg1, %c0_i32 : i32, i32, i32
  }
}

module attributes {stable_mosaic.version = 11 : i64} {
  func.func @_conv_bn_res_relu_kernel(%arg0: i32, %arg1: i32, %arg2: memref<1x1x1x10x10x8xbf16, #tpu.memory_space<vmem>>, %arg3: memref<9x8x8xbf16, #tpu.memory_space<vmem>>, %arg4: memref<1x8xf32, #tpu.memory_space<vmem>>, %arg5: memref<1x64x8xbf16, #tpu.memory_space<vmem>>, %arg6: memref<1x64x8xf32, #tpu.memory_space<vmem>>) attributes {dimension_semantics = [#tpu.dimension_semantics<parallel>, #tpu.dimension_semantics<parallel>], iteration_bounds = array<i64: 2, 1>, scalar_prefetch = 0 : i64, scratch_operands = 0 : i64, tpu.core_type = #tpu.core_type<tc>, window_params = [{transform_indices = @transform_0, window_bounds = array<i64: 1, 1, 1, 10, 10, 8>}, {pipeline_mode = #tpu.pipeline_mode<synchronous>, transform_indices = @transform_1, window_bounds = array<i64: 9, 8, 8>}, {pipeline_mode = #tpu.pipeline_mode<synchronous>, transform_indices = @transform_2, window_bounds = array<i64: 1, 8>}, {transform_indices = @transform_3, window_bounds = array<i64: 1, 64, 8>}, {transform_indices = @transform_4, window_bounds = array<i64: 1, 64, 8>}]} {
    %c8_i32 = arith.constant 8 : i32
    %0 = arith.muli %arg1, %c8_i32 : i32
    %1 = tpu.assume_multiple %0, 8 : i32
    %cst = arith.constant 0.000000e+00 : f32
    %2 = vector.broadcast %cst : f32 to vector<64x8xf32>
    %c0_i32 = arith.constant 0 : i32
    %3 = arith.addi %1, %c0_i32 : i32
    %c0 = arith.constant 0 : index
    %c0_0 = arith.constant 0 : index
    %c0_1 = arith.constant 0 : index
    %4 = arith.index_cast %3 : i32 to index
    %c0_2 = arith.constant 0 : index
    %c0_3 = arith.constant 0 : index
    %5 = vector.load %arg2[%c0, %c0_0, %c0_1, %4, %c0_2, %c0_3] : memref<1x1x1x10x10x8xbf16, #tpu.memory_space<vmem>>, vector<1x1x1x8x8x8xbf16>
    %6 = vector.shape_cast %5 : vector<1x1x1x8x8x8xbf16> to vector<8x8x8xbf16>
    %7 = arith.extf %6 : vector<8x8x8xbf16> to vector<8x8x8xf32>
    %8 = vector.shape_cast %7 : vector<8x8x8xf32> to vector<64x8xf32>
    %9 = arith.truncf %8 : vector<64x8xf32> to vector<64x8xbf16>
    %c0_4 = arith.constant 0 : index
    %c0_5 = arith.constant 0 : index
    %c0_6 = arith.constant 0 : index
    %10 = vector.load %arg3[%c0_4, %c0_5, %c0_6] : memref<9x8x8xbf16, #tpu.memory_space<vmem>>, vector<1x8x8xbf16>
    %11 = vector.shape_cast %10 : vector<1x8x8xbf16> to vector<8x8xbf16>
    %cst_7 = arith.constant dense<0.000000e+00> : vector<64x8xf32>
    %12 = tpu.matmul %9, %11, %cst_7 {dimension_numbers = #tpu.dot_dimension_numbers<[1], [0], [0], [1], [0, 0, 1, 1], [], []>} : vector<64x8xbf16>, vector<8x8xbf16>, vector<64x8xf32> -> vector<64x8xf32>
    %13 = arith.addf %2, %12 : vector<64x8xf32>
    %c0_i32_8 = arith.constant 0 : i32
    %14 = arith.addi %1, %c0_i32_8 : i32
    %c0_9 = arith.constant 0 : index
    %c0_10 = arith.constant 0 : index
    %c0_11 = arith.constant 0 : index
    %15 = arith.index_cast %14 : i32 to index
    %c1 = arith.constant 1 : index
    %c0_12 = arith.constant 0 : index
    %16 = vector.load %arg2[%c0_9, %c0_10, %c0_11, %15, %c1, %c0_12] : memref<1x1x1x10x10x8xbf16, #tpu.memory_space<vmem>>, vector<1x1x1x8x8x8xbf16>
    %17 = vector.shape_cast %16 : vector<1x1x1x8x8x8xbf16> to vector<8x8x8xbf16>
    %18 = arith.extf %17 : vector<8x8x8xbf16> to vector<8x8x8xf32>
    %19 = vector.shape_cast %18 : vector<8x8x8xf32> to vector<64x8xf32>
    %20 = arith.truncf %19 : vector<64x8xf32> to vector<64x8xbf16>
    %c1_13 = arith.constant 1 : index
    %c0_14 = arith.constant 0 : index
    %c0_15 = arith.constant 0 : index
    %21 = vector.load %arg3[%c1_13, %c0_14, %c0_15] : memref<9x8x8xbf16, #tpu.memory_space<vmem>>, vector<1x8x8xbf16>
    %22 = vector.shape_cast %21 : vector<1x8x8xbf16> to vector<8x8xbf16>
    %cst_16 = arith.constant dense<0.000000e+00> : vector<64x8xf32>
    %23 = tpu.matmul %20, %22, %cst_16 {dimension_numbers = #tpu.dot_dimension_numbers<[1], [0], [0], [1], [0, 0, 1, 1], [], []>} : vector<64x8xbf16>, vector<8x8xbf16>, vector<64x8xf32> -> vector<64x8xf32>
    %24 = arith.addf %13, %23 : vector<64x8xf32>
    %c0_i32_17 = arith.constant 0 : i32
    %25 = arith.addi %1, %c0_i32_17 : i32
    %c0_18 = arith.constant 0 : index
    %c0_19 = arith.constant 0 : index
    %c0_20 = arith.constant 0 : index
    %26 = arith.index_cast %25 : i32 to index
    %c2 = arith.constant 2 : index
    %c0_21 = arith.constant 0 : index
    %27 = vector.load %arg2[%c0_18, %c0_19, %c0_20, %26, %c2, %c0_21] : memref<1x1x1x10x10x8xbf16, #tpu.memory_space<vmem>>, vector<1x1x1x8x8x8xbf16>
    %28 = vector.shape_cast %27 : vector<1x1x1x8x8x8xbf16> to vector<8x8x8xbf16>
    %29 = arith.extf %28 : vector<8x8x8xbf16> to vector<8x8x8xf32>
    %30 = vector.shape_cast %29 : vector<8x8x8xf32> to vector<64x8xf32>
    %31 = arith.truncf %30 : vector<64x8xf32> to vector<64x8xbf16>
    %c2_22 = arith.constant 2 : index
    %c0_23 = arith.constant 0 : index
    %c0_24 = arith.constant 0 : index
    %32 = vector.load %arg3[%c2_22, %c0_23, %c0_24] : memref<9x8x8xbf16, #tpu.memory_space<vmem>>, vector<1x8x8xbf16>
    %33 = vector.shape_cast %32 : vector<1x8x8xbf16> to vector<8x8xbf16>
    %cst_25 = arith.constant dense<0.000000e+00> : vector<64x8xf32>
    %34 = tpu.matmul %31, %33, %cst_25 {dimension_numbers = #tpu.dot_dimension_numbers<[1], [0], [0], [1], [0, 0, 1, 1], [], []>} : vector<64x8xbf16>, vector<8x8xbf16>, vector<64x8xf32> -> vector<64x8xf32>
    %35 = arith.addf %24, %34 : vector<64x8xf32>
    %c1_i32 = arith.constant 1 : i32
    %36 = arith.addi %1, %c1_i32 : i32
    %c0_26 = arith.constant 0 : index
    %c0_27 = arith.constant 0 : index
    %c0_28 = arith.constant 0 : index
    %37 = arith.index_cast %36 : i32 to index
    %c0_29 = arith.constant 0 : index
    %c0_30 = arith.constant 0 : index
    %38 = vector.load %arg2[%c0_26, %c0_27, %c0_28, %37, %c0_29, %c0_30] : memref<1x1x1x10x10x8xbf16, #tpu.memory_space<vmem>>, vector<1x1x1x8x8x8xbf16>
    %39 = vector.shape_cast %38 : vector<1x1x1x8x8x8xbf16> to vector<8x8x8xbf16>
    %40 = arith.extf %39 : vector<8x8x8xbf16> to vector<8x8x8xf32>
    %41 = vector.shape_cast %40 : vector<8x8x8xf32> to vector<64x8xf32>
    %42 = arith.truncf %41 : vector<64x8xf32> to vector<64x8xbf16>
    %c3 = arith.constant 3 : index
    %c0_31 = arith.constant 0 : index
    %c0_32 = arith.constant 0 : index
    %43 = vector.load %arg3[%c3, %c0_31, %c0_32] : memref<9x8x8xbf16, #tpu.memory_space<vmem>>, vector<1x8x8xbf16>
    %44 = vector.shape_cast %43 : vector<1x8x8xbf16> to vector<8x8xbf16>
    %cst_33 = arith.constant dense<0.000000e+00> : vector<64x8xf32>
    %45 = tpu.matmul %42, %44, %cst_33 {dimension_numbers = #tpu.dot_dimension_numbers<[1], [0], [0], [1], [0, 0, 1, 1], [], []>} : vector<64x8xbf16>, vector<8x8xbf16>, vector<64x8xf32> -> vector<64x8xf32>
    %46 = arith.addf %35, %45 : vector<64x8xf32>
    %c1_i32_34 = arith.constant 1 : i32
    %47 = arith.addi %1, %c1_i32_34 : i32
    %c0_35 = arith.constant 0 : index
    %c0_36 = arith.constant 0 : index
    %c0_37 = arith.constant 0 : index
    %48 = arith.index_cast %47 : i32 to index
    %c1_38 = arith.constant 1 : index
    %c0_39 = arith.constant 0 : index
    %49 = vector.load %arg2[%c0_35, %c0_36, %c0_37, %48, %c1_38, %c0_39] : memref<1x1x1x10x10x8xbf16, #tpu.memory_space<vmem>>, vector<1x1x1x8x8x8xbf16>
    %50 = vector.shape_cast %49 : vector<1x1x1x8x8x8xbf16> to vector<8x8x8xbf16>
    %51 = arith.extf %50 : vector<8x8x8xbf16> to vector<8x8x8xf32>
    %52 = vector.shape_cast %51 : vector<8x8x8xf32> to vector<64x8xf32>
    %53 = arith.truncf %52 : vector<64x8xf32> to vector<64x8xbf16>
    %c4 = arith.constant 4 : index
    %c0_40 = arith.constant 0 : index
    %c0_41 = arith.constant 0 : index
    %54 = vector.load %arg3[%c4, %c0_40, %c0_41] : memref<9x8x8xbf16, #tpu.memory_space<vmem>>, vector<1x8x8xbf16>
    %55 = vector.shape_cast %54 : vector<1x8x8xbf16> to vector<8x8xbf16>
    %cst_42 = arith.constant dense<0.000000e+00> : vector<64x8xf32>
    %56 = tpu.matmul %53, %55, %cst_42 {dimension_numbers = #tpu.dot_dimension_numbers<[1], [0], [0], [1], [0, 0, 1, 1], [], []>} : vector<64x8xbf16>, vector<8x8xbf16>, vector<64x8xf32> -> vector<64x8xf32>
    %57 = arith.addf %46, %56 : vector<64x8xf32>
    %c1_i32_43 = arith.constant 1 : i32
    %58 = arith.addi %1, %c1_i32_43 : i32
    %c0_44 = arith.constant 0 : index
    %c0_45 = arith.constant 0 : index
    %c0_46 = arith.constant 0 : index
    %59 = arith.index_cast %58 : i32 to index
    %c2_47 = arith.constant 2 : index
    %c0_48 = arith.constant 0 : index
    %60 = vector.load %arg2[%c0_44, %c0_45, %c0_46, %59, %c2_47, %c0_48] : memref<1x1x1x10x10x8xbf16, #tpu.memory_space<vmem>>, vector<1x1x1x8x8x8xbf16>
    %61 = vector.shape_cast %60 : vector<1x1x1x8x8x8xbf16> to vector<8x8x8xbf16>
    %62 = arith.extf %61 : vector<8x8x8xbf16> to vector<8x8x8xf32>
    %63 = vector.shape_cast %62 : vector<8x8x8xf32> to vector<64x8xf32>
    %64 = arith.truncf %63 : vector<64x8xf32> to vector<64x8xbf16>
    %c5 = arith.constant 5 : index
    %c0_49 = arith.constant 0 : index
    %c0_50 = arith.constant 0 : index
    %65 = vector.load %arg3[%c5, %c0_49, %c0_50] : memref<9x8x8xbf16, #tpu.memory_space<vmem>>, vector<1x8x8xbf16>
    %66 = vector.shape_cast %65 : vector<1x8x8xbf16> to vector<8x8xbf16>
    %cst_51 = arith.constant dense<0.000000e+00> : vector<64x8xf32>
    %67 = tpu.matmul %64, %66, %cst_51 {dimension_numbers = #tpu.dot_dimension_numbers<[1], [0], [0], [1], [0, 0, 1, 1], [], []>} : vector<64x8xbf16>, vector<8x8xbf16>, vector<64x8xf32> -> vector<64x8xf32>
    %68 = arith.addf %57, %67 : vector<64x8xf32>
    %c2_i32 = arith.constant 2 : i32
    %69 = arith.addi %1, %c2_i32 : i32
    %c0_52 = arith.constant 0 : index
    %c0_53 = arith.constant 0 : index
    %c0_54 = arith.constant 0 : index
    %70 = arith.index_cast %69 : i32 to index
    %c0_55 = arith.constant 0 : index
    %c0_56 = arith.constant 0 : index
    %71 = vector.load %arg2[%c0_52, %c0_53, %c0_54, %70, %c0_55, %c0_56] : memref<1x1x1x10x10x8xbf16, #tpu.memory_space<vmem>>, vector<1x1x1x8x8x8xbf16>
    %72 = vector.shape_cast %71 : vector<1x1x1x8x8x8xbf16> to vector<8x8x8xbf16>
    %73 = arith.extf %72 : vector<8x8x8xbf16> to vector<8x8x8xf32>
    %74 = vector.shape_cast %73 : vector<8x8x8xf32> to vector<64x8xf32>
    %75 = arith.truncf %74 : vector<64x8xf32> to vector<64x8xbf16>
    %c6 = arith.constant 6 : index
    %c0_57 = arith.constant 0 : index
    %c0_58 = arith.constant 0 : index
    %76 = vector.load %arg3[%c6, %c0_57, %c0_58] : memref<9x8x8xbf16, #tpu.memory_space<vmem>>, vector<1x8x8xbf16>
    %77 = vector.shape_cast %76 : vector<1x8x8xbf16> to vector<8x8xbf16>
    %cst_59 = arith.constant dense<0.000000e+00> : vector<64x8xf32>
    %78 = tpu.matmul %75, %77, %cst_59 {dimension_numbers = #tpu.dot_dimension_numbers<[1], [0], [0], [1], [0, 0, 1, 1], [], []>} : vector<64x8xbf16>, vector<8x8xbf16>, vector<64x8xf32> -> vector<64x8xf32>
    %79 = arith.addf %68, %78 : vector<64x8xf32>
    %c2_i32_60 = arith.constant 2 : i32
    %80 = arith.addi %1, %c2_i32_60 : i32
    %c0_61 = arith.constant 0 : index
    %c0_62 = arith.constant 0 : index
    %c0_63 = arith.constant 0 : index
    %81 = arith.index_cast %80 : i32 to index
    %c1_64 = arith.constant 1 : index
    %c0_65 = arith.constant 0 : index
    %82 = vector.load %arg2[%c0_61, %c0_62, %c0_63, %81, %c1_64, %c0_65] : memref<1x1x1x10x10x8xbf16, #tpu.memory_space<vmem>>, vector<1x1x1x8x8x8xbf16>
    %83 = vector.shape_cast %82 : vector<1x1x1x8x8x8xbf16> to vector<8x8x8xbf16>
    %84 = arith.extf %83 : vector<8x8x8xbf16> to vector<8x8x8xf32>
    %85 = vector.shape_cast %84 : vector<8x8x8xf32> to vector<64x8xf32>
    %86 = arith.truncf %85 : vector<64x8xf32> to vector<64x8xbf16>
    %c7 = arith.constant 7 : index
    %c0_66 = arith.constant 0 : index
    %c0_67 = arith.constant 0 : index
    %87 = vector.load %arg3[%c7, %c0_66, %c0_67] : memref<9x8x8xbf16, #tpu.memory_space<vmem>>, vector<1x8x8xbf16>
    %88 = vector.shape_cast %87 : vector<1x8x8xbf16> to vector<8x8xbf16>
    %cst_68 = arith.constant dense<0.000000e+00> : vector<64x8xf32>
    %89 = tpu.matmul %86, %88, %cst_68 {dimension_numbers = #tpu.dot_dimension_numbers<[1], [0], [0], [1], [0, 0, 1, 1], [], []>} : vector<64x8xbf16>, vector<8x8xbf16>, vector<64x8xf32> -> vector<64x8xf32>
    %90 = arith.addf %79, %89 : vector<64x8xf32>
    %c2_i32_69 = arith.constant 2 : i32
    %91 = arith.addi %1, %c2_i32_69 : i32
    %c0_70 = arith.constant 0 : index
    %c0_71 = arith.constant 0 : index
    %c0_72 = arith.constant 0 : index
    %92 = arith.index_cast %91 : i32 to index
    %c2_73 = arith.constant 2 : index
    %c0_74 = arith.constant 0 : index
    %93 = vector.load %arg2[%c0_70, %c0_71, %c0_72, %92, %c2_73, %c0_74] : memref<1x1x1x10x10x8xbf16, #tpu.memory_space<vmem>>, vector<1x1x1x8x8x8xbf16>
    %94 = vector.shape_cast %93 : vector<1x1x1x8x8x8xbf16> to vector<8x8x8xbf16>
    %95 = arith.extf %94 : vector<8x8x8xbf16> to vector<8x8x8xf32>
    %96 = vector.shape_cast %95 : vector<8x8x8xf32> to vector<64x8xf32>
    %97 = arith.truncf %96 : vector<64x8xf32> to vector<64x8xbf16>
    %c8 = arith.constant 8 : index
    %c0_75 = arith.constant 0 : index
    %c0_76 = arith.constant 0 : index
    %98 = vector.load %arg3[%c8, %c0_75, %c0_76] : memref<9x8x8xbf16, #tpu.memory_space<vmem>>, vector<1x8x8xbf16>
    %99 = vector.shape_cast %98 : vector<1x8x8xbf16> to vector<8x8xbf16>
    %cst_77 = arith.constant dense<0.000000e+00> : vector<64x8xf32>
    %100 = tpu.matmul %97, %99, %cst_77 {dimension_numbers = #tpu.dot_dimension_numbers<[1], [0], [0], [1], [0, 0, 1, 1], [], []>} : vector<64x8xbf16>, vector<8x8xbf16>, vector<64x8xf32> -> vector<64x8xf32>
    %101 = arith.addf %90, %100 : vector<64x8xf32>
    %c0_78 = arith.constant 0 : index
    %c0_79 = arith.constant 0 : index
    %102 = vector.load %arg4[%c0_78, %c0_79] : memref<1x8xf32, #tpu.memory_space<vmem>>, vector<1x8xf32>
    %103 = vector.broadcast %102 : vector<1x8xf32> to vector<64x8xf32>
    %104 = arith.addf %101, %103 : vector<64x8xf32>
    %c0_80 = arith.constant 0 : index
    %c0_81 = arith.constant 0 : index
    %c0_82 = arith.constant 0 : index
    %105 = vector.load %arg5[%c0_80, %c0_81, %c0_82] : memref<1x64x8xbf16, #tpu.memory_space<vmem>>, vector<1x64x8xbf16>
    %106 = vector.shape_cast %105 : vector<1x64x8xbf16> to vector<64x8xbf16>
    %107 = arith.extf %106 : vector<64x8xbf16> to vector<64x8xf32>
    %108 = arith.addf %104, %107 : vector<64x8xf32>
    %cst_83 = arith.constant 0.000000e+00 : f32
    %109 = vector.broadcast %cst_83 : f32 to vector<64x8xf32>
    %110 = arith.maximumf %108, %109 : vector<64x8xf32>
    %c0_84 = arith.constant 0 : index
    %c0_85 = arith.constant 0 : index
    %c0_86 = arith.constant 0 : index
    %111 = vector.load %arg6[%c0_84, %c0_85, %c0_86] : memref<1x64x8xf32, #tpu.memory_space<vmem>>, vector<1x64x8xf32>
    %112 = vector.shape_cast %111 : vector<1x64x8xf32> to vector<64x8xf32>
    %113 = vector.shape_cast %110 : vector<64x8xf32> to vector<1x64x8xf32>
    tpu.vector_store %arg6[%c0_84, %c0_85, %c0_86], %113 {strides = array<i32>} : memref<1x64x8xf32, #tpu.memory_space<vmem>>, vector<1x64x8xf32>,
    return
  }
  func.func @transform_0(%arg0: i32, %arg1: i32) -> (i32, i32, i32, i32, i32, i32) {
    %c0_i32 = arith.constant 0 : i32
    %c0_i32_0 = arith.constant 0 : i32
    %c0_i32_1 = arith.constant 0 : i32
    %c0_i32_2 = arith.constant 0 : i32
    %c0_i32_3 = arith.constant 0 : i32
    %c0_i32_4 = arith.constant 0 : i32
    return %arg0, %c0_i32, %c0_i32_0, %c0_i32_1, %c0_i32_2, %c0_i32_3 : i32, i32, i32, i32, i32, i32
  }
  func.func @transform_1(%arg0: i32, %arg1: i32) -> (i32, i32, i32) {
    %c0_i32 = arith.constant 0 : i32
    %c0_i32_0 = arith.constant 0 : i32
    %c0_i32_1 = arith.constant 0 : i32
    %c0_i32_2 = arith.constant 0 : i32
    return %c0_i32, %c0_i32_0, %c0_i32_1 : i32, i32, i32
  }
  func.func @transform_2(%arg0: i32, %arg1: i32) -> (i32, i32) {
    %c0_i32 = arith.constant 0 : i32
    %c0_i32_0 = arith.constant 0 : i32
    %c0_i32_1 = arith.constant 0 : i32
    return %c0_i32, %c0_i32_0 : i32, i32
  }
  func.func @transform_3(%arg0: i32, %arg1: i32) -> (i32, i32, i32) {
    %c0_i32 = arith.constant 0 : i32
    %c0_i32_0 = arith.constant 0 : i32
    return %arg0, %arg1, %c0_i32 : i32, i32, i32
  }
  func.func @transform_4(%arg0: i32, %arg1: i32) -> (i32, i32, i32) {
    %c0_i32 = arith.constant 0 : i32
    %c0_i32_0 = arith.constant 0 : i32
    return %arg0, %arg1, %c0_i32 : i32, i32, i32
  }
}

module attributes {stable_mosaic.version = 11 : i64} {
  func.func @_conv_bn_kernel(%arg0: i32, %arg1: i32, %arg2: memref<1x2x2x8x8x8xbf16, #tpu.memory_space<vmem>>, %arg3: memref<1x8x8xbf16, #tpu.memory_space<vmem>>, %arg4: memref<1x8xf32, #tpu.memory_space<vmem>>, %arg5: memref<1x64x8xbf16, #tpu.memory_space<vmem>>) attributes {dimension_semantics = [#tpu.dimension_semantics<parallel>, #tpu.dimension_semantics<parallel>], iteration_bounds = array<i64: 2, 1>, scalar_prefetch = 0 : i64, scratch_operands = 0 : i64, tpu.core_type = #tpu.core_type<tc>, window_params = [{transform_indices = @transform_0, window_bounds = array<i64: 1, 2, 2, 8, 8, 8>}, {pipeline_mode = #tpu.pipeline_mode<synchronous>, transform_indices = @transform_1, window_bounds = array<i64: 1, 8, 8>}, {pipeline_mode = #tpu.pipeline_mode<synchronous>, transform_indices = @transform_2, window_bounds = array<i64: 1, 8>}, {transform_indices = @transform_3, window_bounds = array<i64: 1, 64, 8>}]} {
    %c8_i32 = arith.constant 8 : i32
    %0 = arith.muli %arg1, %c8_i32 : i32
    %1 = tpu.assume_multiple %0, 8 : i32
    %cst = arith.constant 0.000000e+00 : f32
    %2 = vector.broadcast %cst : f32 to vector<64x8xf32>
    %c0_i32 = arith.constant 0 : i32
    %3 = arith.addi %1, %c0_i32 : i32
    %c0 = arith.constant 0 : index
    %c0_0 = arith.constant 0 : index
    %c0_1 = arith.constant 0 : index
    %4 = arith.index_cast %3 : i32 to index
    %c0_2 = arith.constant 0 : index
    %c0_3 = arith.constant 0 : index
    %5 = vector.load %arg2[%c0, %c0_0, %c0_1, %4, %c0_2, %c0_3] : memref<1x2x2x8x8x8xbf16, #tpu.memory_space<vmem>>, vector<1x1x1x8x8x8xbf16>
    %6 = vector.shape_cast %5 : vector<1x1x1x8x8x8xbf16> to vector<8x8x8xbf16>
    %7 = arith.extf %6 : vector<8x8x8xbf16> to vector<8x8x8xf32>
    %8 = vector.shape_cast %7 : vector<8x8x8xf32> to vector<64x8xf32>
    %9 = arith.truncf %8 : vector<64x8xf32> to vector<64x8xbf16>
    %c0_4 = arith.constant 0 : index
    %c0_5 = arith.constant 0 : index
    %c0_6 = arith.constant 0 : index
    %10 = vector.load %arg3[%c0_4, %c0_5, %c0_6] : memref<1x8x8xbf16, #tpu.memory_space<vmem>>, vector<1x8x8xbf16>
    %11 = vector.shape_cast %10 : vector<1x8x8xbf16> to vector<8x8xbf16>
    %cst_7 = arith.constant dense<0.000000e+00> : vector<64x8xf32>
    %12 = tpu.matmul %9, %11, %cst_7 {dimension_numbers = #tpu.dot_dimension_numbers<[1], [0], [0], [1], [0, 0, 1, 1], [], []>} : vector<64x8xbf16>, vector<8x8xbf16>, vector<64x8xf32> -> vector<64x8xf32>
    %13 = arith.addf %2, %12 : vector<64x8xf32>
    %c0_8 = arith.constant 0 : index
    %c0_9 = arith.constant 0 : index
    %14 = vector.load %arg4[%c0_8, %c0_9] : memref<1x8xf32, #tpu.memory_space<vmem>>, vector<1x8xf32>
    %15 = vector.broadcast %14 : vector<1x8xf32> to vector<64x8xf32>
    %16 = arith.addf %13, %15 : vector<64x8xf32>
    %17 = arith.truncf %16 : vector<64x8xf32> to vector<64x8xbf16>
    %c0_10 = arith.constant 0 : index
    %c0_11 = arith.constant 0 : index
    %c0_12 = arith.constant 0 : index
    %18 = vector.load %arg5[%c0_10, %c0_11, %c0_12] : memref<1x64x8xbf16, #tpu.memory_space<vmem>>, vector<1x64x8xbf16>
    %19 = vector.shape_cast %18 : vector<1x64x8xbf16> to vector<64x8xbf16>
    %20 = vector.shape_cast %17 : vector<64x8xbf16> to vector<1x64x8xbf16>
    tpu.vector_store %arg5[%c0_10, %c0_11, %c0_12], %20 {strides = array<i32>} : memref<1x64x8xbf16, #tpu.memory_space<vmem>>, vector<1x64x8xbf16>,
    return
  }
  func.func @transform_0(%arg0: i32, %arg1: i32) -> (i32, i32, i32, i32, i32, i32) {
    %c0_i32 = arith.constant 0 : i32
    %c0_i32_0 = arith.constant 0 : i32
    %c0_i32_1 = arith.constant 0 : i32
    %c0_i32_2 = arith.constant 0 : i32
    %c0_i32_3 = arith.constant 0 : i32
    %c0_i32_4 = arith.constant 0 : i32
    return %arg0, %c0_i32, %c0_i32_0, %c0_i32_1, %c0_i32_2, %c0_i32_3 : i32, i32, i32, i32, i32, i32
  }
  func.func @transform_1(%arg0: i32, %arg1: i32) -> (i32, i32, i32) {
    %c0_i32 = arith.constant 0 : i32
    %c0_i32_0 = arith.constant 0 : i32
    %c0_i32_1 = arith.constant 0 : i32
    %c0_i32_2 = arith.constant 0 : i32
    return %c0_i32, %c0_i32_0, %c0_i32_1 : i32, i32, i32
  }
  func.func @transform_2(%arg0: i32, %arg1: i32) -> (i32, i32) {
    %c0_i32 = arith.constant 0 : i32
    %c0_i32_0 = arith.constant 0 : i32
    %c0_i32_1 = arith.constant 0 : i32
    return %c0_i32, %c0_i32_0 : i32, i32
  }
  func.func @transform_3(%arg0: i32, %arg1: i32) -> (i32, i32, i32) {
    %c0_i32 = arith.constant 0 : i32
    %c0_i32_0 = arith.constant 0 : i32
    return %arg0, %arg1, %c0_i32 : i32, i32, i32
  }
}

</mosaic_0001>

<bundles_post_ra>
// kernel: basic_block_forward.4
= control target key start
LH: loop header
LB: loop body
LE: loop exit
PB: predicated region body
PF: predicated region fallthrough
CT: control target
= control target key end

     0   :  { %s561_s12 = smov 0   ;;  %s563_s13 = smov 0   ;;  %s608_s0 = inlined_call_operand.vmem [shape: bf16[2,2,2,8,8,8], index: 0, kind: input, shape index: {}]   ;;  %s609_s1 = inlined_call_operand.vmem [shape: bf16[1,8,8], index: 1, kind: input, shape index: {}]   ;;  %s610_s2 = inlined_call_operand.vmem [shape: f32[1,8], index: 2, kind: input, shape index: {}]   ;;  %s611_s3 = inlined_call_operand.vmem [shape: bf16[2,64,8], index: 3, kind: output, shape index: {}]  }
   0x1   :  { %s565_s14 = smov 0  }
   0x2 LB: > { %s25_s15 = sadd.s32 1, %s535_s13  ;;  %p436_p0 = scmp.ge.s32.totalorder %s539_s14, 1  ;;  %s539_s14 = sphi %s565_s14, %s13_s14   ;;  %s535_s13 = sphi %s563_s13, %s613_s13   ;;  %s531_s12 = sphi %s561_s12, %s612_s12  }
   0x3   : > { %p27_p1 = scmp.ge.s32.totalorder %s25_s15, 2  ;;  %p151_p2 = scmp.lt.s32.totalorder %s539_s14, 3 }
   0x5   : > { %s615_s15 = smov (%p27_p1, %s25_s15), 0  ;;  %p152_p3 = pnand %p436_p0, %p151_p2 }
   0x6   : > { %v218_v0 = vld [vmem:[%s609_s1] sm:$0xf] (!%p152_p3)  ;;  %vm239_vm0 = vcmask (!%p152_p3), 1043456   ;;  %p179_p4 = scmp.lt.s32.totalorder (!%p152_p3), %s531_s12, 1  ;;  %vm226_vm1 = vcmask (!%p152_p3), 64512   ;;  %vm340_vm2 = vcmask (!%p152_p3), 60416  }
   0x7   : > { %155 = sbr.rel (%p152_p3) target bundleno = 239 (0xef), region = 32  ;;  %487 = vmatprep.subr.msk.bf16.mxu0 (!%p152_p3), %vm239_vm0, %v218_v0  ;;  %488 = vmatprep.subr.msk.bf16.mxu1 (!%p152_p3), %vm239_vm0, %v218_v0  ;;  %v241_v1 = vsel (!%p152_p3), %vm239_vm0, %v218_v0, 0  ;;  %v445_v6 = vld [vmem:[%s610_s2] ss:$0 sm:$0xff] (!%p152_p3) }
   0x8   : > { %476 = vmatpush3.bf16.msra.mxu0 (!%p152_p3), %v241_v1  ;;  %486 = vmatpush3.bf16.msra.mxu1 (!%p152_p3), %v241_v1 }
   0xe   : > { %s617_s12 = smov (!%p179_p4, %s531_s12), 1 }
   0xf   : > { %s460_s18 = sshll.u32 %s617_s12, 7  ;;  %s461_s24 = sshll.u32 %s617_s12, 5 }
  0x10   : > { %s183_s21 = scalar_lea.vmem %s608_s0, %s460_s18  ;;  %s192_s27 = scalar_lea.vmem %s611_s3, %s461_s24 }
  0x11   : > { %v513_v2 = vld [vmem:[%s183_s21] sm:$0xff]   ;;  %v514_v3 = vld [vmem:[%s183_s21 + $0x10] sm:$0xff]   ;;  %v515_v4 = vld [vmem:[%s183_s21 + $0x8] sm:$0xff]  }
  0x12   : > { %477 = vmatprep.mubr.msk.bf16.mxu0 %vm226_vm1, %v513_v2  ;;  %481 = vmatprep.mubr.msk.bf16.mxu1 %vm226_vm1, %v514_v3  ;;  %v516_v5 = vld [vmem:[%s183_s21 + $0x18] sm:$0xff]  }
  0x13   : > { %478 = vmatmul.mubr.msk.bf16.vlgmr.msra.gmra.mrb[0].mxu0 %vm226_vm1, %v515_v4  ;;  %482 = vmatmul.mubr.msk.bf16.vlgmr.msra.gmra.mrb[0].mxu1 %vm226_vm1, %v516_v5 }
  0xe6   : > { %v479_v7 = vpop.f32.mrb[0].mxu0  ;;  %v483_v9 = vpop.f32.mrb[0].mxu1 }
  0xe7   : > { %v286_v8 = vadd.f32 %v479_v7, %v445_v6  ;;  %v277_v10 = vpop.f32.mrb[1].mxu0  ;;  %v302_v11 = vadd.f32 %v483_v9, %v445_v6  ;;  %v293_v13 = vpop.f32.mrb[1].mxu1 }
  0xe8   : > { %v278_v12 = vadd.f32 %v445_v6, %v277_v10  ;;  %v480_v14 = vpop.f32.mrb[2].mxu0  ;;  %v294_v16 = vadd.f32 %v445_v6, %v293_v13  ;;  %v484_v18 = vpop.f32.mrb[2].mxu1 }
  0xe9   : > { %v464_v15 = vpack.c.bf16 %v286_v8, %v286_v8  ;;  %v289_v17 = vadd.f32 %v480_v14, %v445_v6  ;;  %v280_v19 = vpop.f32.mrb[3].mxu0  ;;  %v468_v20 = vpack.c.bf16 %v302_v11, %v302_v11  ;;  %v305_v22 = vadd.f32 %v484_v18, %v445_v6  ;;  %v296_v24 = vpop.f32.mrb[3].mxu1 }
  0xea   : > { %v462_v21 = vpack.c.bf16 %v278_v12, %v278_v12  ;;  %v281_v23 = vadd.f32 %v445_v6, %v280_v19  ;;  %v466_v25 = vpack.c.bf16 %v294_v16, %v294_v16  ;;  %v297_v27 = vadd.f32 %v445_v6, %v296_v24 }
  0xeb   : > { %343 = vst.msk [vmem:[%s192_s27 + $0x8] sm:$0xf] %vm340_vm2, %v464_v15  ;;  %v465_v26 = vpack.c.bf16 %v289_v17, %v289_v17  ;;  %347 = vst.msk [vmem:[%s192_s27 + $0x18] sm:$0xf] %vm340_vm2, %v468_v20  ;;  %v469_v28 = vpack.c.bf16 %v305_v22, %v305_v22 }
  0xec   : > { %341 = vst.msk [vmem:[%s192_s27] sm:$0xf] %vm340_vm2, %v462_v21  ;;  %v463_v29 = vpack.c.bf16 %v281_v23, %v281_v23  ;;  %345 = vst.msk [vmem:[%s192_s27 + $0x10] sm:$0xf] %vm340_vm2, %v466_v25  ;;  %v467_v30 = vpack.c.bf16 %v297_v27, %v297_v27 }
  0xed   : > { %344 = vst.msk [vmem:[%s192_s27 + $0xc] sm:$0xf] %vm340_vm2, %v465_v26  ;;  %348 = vst.msk [vmem:[%s192_s27 + $0x1c] sm:$0xf] %vm340_vm2, %v469_v28 }
  0xee   : > { %342 = vst.msk [vmem:[%s192_s27 + $0x4] sm:$0xf] %vm340_vm2, %v463_v29  ;;  %346 = vst.msk [vmem:[%s192_s27 + $0x14] sm:$0xf] %vm340_vm2, %v467_v30 }
  0xef PF: > { %s13_s14 = sadd.s32 1, %s539_s14   ;;  %s612_s12 = smov %s535_s13 }
  0xf0   : > { %p10_p5 = scmp.ge.s32.totalorder %s13_s14, 4   ;;  %s613_s13 = smov %s615_s15 }
  0xf2   :  { %12 = sbr.rel (!%p10_p5) target bundleno = 2 (0x2), region = 63 }

// kernel: basic_block_forward.3
= control target key start
LH: loop header
LB: loop body
LE: loop exit
PB: predicated region body
PF: predicated region fallthrough
CT: control target
= control target key end

     0   :  { %s2023_s12 = smov 0   ;;  %s2025_s13 = smov 0   ;;  %s2270_s0 = inlined_call_operand.vmem [shape: bf16[2,2,2,9,9,8], index: 0, kind: input, shape index: {}]   ;;  %s2271_s1 = inlined_call_operand.vmem [shape: bf16[9,8,8], index: 1, kind: input, shape index: {}]   ;;  %s2272_s2 = inlined_call_operand.vmem [shape: f32[1,8], index: 2, kind: input, shape index: {}]   ;;  %s2273_s3 = inlined_call_operand.vmem [shape: bf16[2,64,8], index: 3, kind: output, shape index: {}]  }
   0x1   :  { %s2027_s14 = smov 0  }
   0x2 LB: > { %s25_s15 = sadd.s32 1, %s1997_s13  ;;  %p1555_p0 = scmp.ge.s32.totalorder %s2001_s14, 1  ;;  %s2001_s14 = sphi %s2027_s14, %s13_s14   ;;  %s1997_s13 = sphi %s2025_s13, %s2275_s13   ;;  %s1993_s12 = sphi %s2023_s12, %s2274_s12  }
   0x3   : > { %p27_p1 = scmp.ge.s32.totalorder %s25_s15, 2  ;;  %p151_p2 = scmp.lt.s32.totalorder %s2001_s14, 3 }
   0x5   : > { %s2277_s15 = smov (%p27_p1, %s25_s15), 0  ;;  %p152_p3 = pnand %p1555_p0, %p151_p2 }
   0x6   : > { %v1575_v0 = vld [vmem:[%s2271_s1 + $0x4] sm:$0xf] (!%p152_p3)  ;;  %vm258_vm0 = vcmask (!%p152_p3), 1043456   ;;  %v2047_v1 = vld [vmem:[%s2271_s1 + $0x10] sm:$0xf] (!%p152_p3)  ;;  %p179_p4 = scmp.lt.s32.totalorder (!%p152_p3), %s1993_s12, 1 }
   0x7   : > { %155 = sbr.rel (%p152_p3) target bundleno = 312 (0x138), region = 32  ;;  %1920 = vmatprep.subr.msk.bf16.mxu1 (!%p152_p3), %vm258_vm0, %v1575_v0  ;;  %1924 = vmatprep.subr.msk.bf16.mxu0 (!%p152_p3), %vm258_vm0, %v2047_v1  ;;  %v260_v2 = vsel (!%p152_p3), %vm258_vm0, %v1575_v0, 0  ;;  %v2055_v3 = vsel (!%p152_p3), %vm258_vm0, %v2047_v1, 0  ;;  %v219_v4 = vld [vmem:[%s2271_s1] sm:$0xf] (!%p152_p3)  ;;  %vm245_vm1 = vcmask (!%p152_p3), 64512  }
   0x8   : > { %1765 = vmatpush3.bf16.msra.mxu1 (!%p152_p3), %v260_v2  ;;  %1805 = vmatpush3.bf16.msra.mxu0 (!%p152_p3), %v2055_v3  ;;  %v1639_v5 = vld [vmem:[%s2271_s1 + $0x14] sm:$0xf] (!%p152_p3)  ;;  %v340_v6 = vsel (!%p152_p3), %vm258_vm0, %v219_v4, 0  ;;  %v1656_v11 = vld [vmem:[%s2271_s1 + $0x18] sm:$0xf] (!%p152_p3)  ;;  %vm455_vm2 = vcmask (!%p152_p3), 1046528  }
   0x9   : > { %1921 = vmatprep.subr.msk.bf16.mxu1 (!%p152_p3), %vm258_vm0, %v219_v4  ;;  %1926 = vmatprep.subr.msk.bf16.mxu0 (!%p152_p3), %vm258_vm0, %v1639_v5  ;;  %v907_v7 = vsel (!%p152_p3), %vm258_vm0, %v1639_v5, 0  ;;  %v2086_v12 = vld [vmem:[%s2271_s1 + $0x8] sm:$0xf] (!%p152_p3)  ;;  %v1021_v41 = vsel (!%p152_p3), %vm258_vm0, %v1656_v11, 0  ;;  %v2123_v61 = vld [vmem:[%s2271_s1 + $0x1c] sm:$0xf] (!%p152_p3) }
   0xa   : > { %vm1438_vm3 = vcmask (!%p152_p3), 60416  }
   0xe   : > { %s2279_s12 = smov (!%p179_p4, %s1993_s12), 1 }
   0xf   : > { %s1930_s24 = smul.u32 288, %s2279_s12  ;;  %s1710_s17 = sshll.u32 %s2279_s12, 5 }
  0x10   : > { %s2243_s20 = scalar_lea.vmem %s2273_s3, %s1710_s17 }
  0x11   : > { %s2072_s27 = scalar_lea.vmem %s2270_s0, %s1930_s24 }
  0x12   : > { %v1955_v8 = vld [vmem:[%s2072_s27 + $0x48] ss:$8 sps:$4 sm:$0xff]   ;;  %v1956_v9 = vld [vmem:[%s2072_s27 + $0xd8] ss:$8 sps:$4 sm:$0xff]   ;;  %v1624_v17 = vld [vmem:[%s2072_s27 + $0x94] sm:$0x1] }
  0x13   : > { %1766 = vmatprep.mubr.msk.bf16.mxu1 %vm245_vm1, %v1955_v8  ;;  %v1957_v10 = vld [vmem:[%s2072_s27 + $0x58] ss:$8 sps:$4 sm:$0xff]   ;;  %1806 = vmatprep.mubr.msk.bf16.mxu0 %vm245_vm1, %v1956_v9  ;;  %v1958_v13 = vld [vmem:[%s2072_s27 + $0xe8] ss:$8 sps:$4 sm:$0xff]   ;;  %v1626_v18 = vld [vmem:[%s2072_s27 + $0x9c] sm:$0x1]  ;;  %v825_v20 = vunpack.c.l.bf16 %v1624_v17 }
  0x14   : > { %1767 = vmatmul.mubr.msk.bf16.vlgmr.msra.gmra.mrb[0].mxu1 %vm245_vm1, %v1957_v10  ;;  %v1959_v14 = vld [vmem:[%s2072_s27 + $0x68] ss:$8 sps:$4 sm:$0xff]   ;;  %1807 = vmatmul.mubr.msk.bf16.vlgmr.msra.gmra.mrb[0].mxu0 %vm245_vm1, %v1958_v13  ;;  %v1960_v15 = vld [vmem:[%s2072_s27 + $0x78] ss:$8 sps:$4 sm:$0xff]   ;;  %v827_v22 = vunpack.c.l.bf16 %v1626_v18  ;;  %v1628_v24 = vld [vmem:[%s2072_s27 + $0xa4] sm:$0x1] }
  0x15   : > { %1775 = vmatpush3.bf16.msra.mxu1 %v340_v6  ;;  %1815 = vmatpush3.bf16.msra.mxu0 %v907_v7  ;;  %v1623_v16 = vld [vmem:[%s2072_s27 + $0x90] ss:$8 sps:$4 sm:$0xff]   ;;  %v1627_v23 = vld [vmem:[%s2072_s27 + $0xa0] ss:$8 sps:$4 sm:$0xff]   ;;  %v1630_v25 = vld [vmem:[%s2072_s27 + $0xac] sm:$0x1]  ;;  %v829_v27 = vunpack.c.l.bf16 %v1628_v24 }
  0x16   : > { %1770 = vmatprep.mubr.msk.bf16.mxu1 %vm245_vm1, %v1959_v14  ;;  %v824_v19 = vunpack.c.l.bf16 %v1623_v16  ;;  %v826_v21 = vunpack.c.h.bf16 %v1623_v16  ;;  %1927 = vmatprep.subr.msk.bf16.mxu0 %vm258_vm0, %v1656_v11  ;;  %v828_v26 = vunpack.c.l.bf16 %v1627_v23  ;;  %v830_v28 = vunpack.c.h.bf16 %v1627_v23  ;;  %v1961_v30 = vld [vmem:[%s2072_s27] ss:$8 sps:$4 sm:$0xff]   ;;  %v1631_v42 = vld [vmem:[%s2072_s27 + $0xb0] ss:$8 sps:$4 sm:$0xff]   ;;  %v1632_v43 = vld [vmem:[%s2072_s27 + $0xb4] sm:$0x1] }
  0x17   : > { %1922 = vmatprep.subr.msk.bf16.mxu1 %vm258_vm0, %v2086_v12  ;;  %v831_v29 = vunpack.c.l.bf16 %v1630_v25  ;;  %v857_v32 = vrot.slane %v825_v20, 1  ;;  %v860_v34 = vrot.slane %v827_v22, 1  ;;  %v863_v36 = vrot.slane %v829_v27, 1  ;;  %v1634_v47 = vld [vmem:[%s2072_s27 + $0xbc] sm:$0x1] }
  0x18   : > { %v856_v31 = vrot.slane %v824_v19, 1  ;;  %v859_v33 = vrot.slane %v826_v21, 1  ;;  %v862_v35 = vrot.slane %v828_v26, 1  ;;  %v865_v37 = vrot.slane %v830_v28, 1  ;;  %v1635_v49 = vld [vmem:[%s2072_s27 + $0xc0] ss:$8 sps:$4 sm:$0xff]  }
  0x19   : > { %v866_v38 = vrot.slane %v831_v29, 1  ;;  %v832_v48 = vunpack.c.l.bf16 %v1631_v42  ;;  %v1636_v50 = vld [vmem:[%s2072_s27 + $0xc4] sm:$0x1]  ;;  %v833_v52 = vunpack.c.l.bf16 %v1632_v43  ;;  %v834_v53 = vunpack.c.h.bf16 %v1631_v42  ;;  %v1638_v55 = vld [vmem:[%s2072_s27 + $0xcc] sm:$0x1] }
  0x1a   : > { %v858_v39 = vsel %vm455_vm2, %v856_v31, %v857_v32  ;;  %v861_v40 = vsel %vm455_vm2, %v859_v33, %v860_v34  ;;  %v864_v45 = vsel %vm455_vm2, %v862_v35, %v863_v36  ;;  %v835_v54 = vunpack.c.l.bf16 %v1634_v47  ;;  %v1962_v56 = vld [vmem:[%s2072_s27 + $0x10] ss:$8 sps:$4 sm:$0xff]   ;;  %v1963_v7 = vld [vmem:[%s2072_s27 + $0x20] ss:$8 sps:$4 sm:$0xff]   ;;  %v408_v17 = vld [vmem:[%s2072_s27 + $0x4] sm:$0x1] }
  0x1b   : > { %v888_v44 = vpack.c.bf16 %v861_v40, %v858_v39  ;;  %v867_v46 = vsel %vm455_vm2, %v865_v37, %v866_v38  ;;  %v868_v57 = vrot.slane %v832_v48, 1  ;;  %v836_v58 = vunpack.c.l.bf16 %v1635_v49  ;;  %v407_v16 = vld [vmem:[%s2072_s27] ss:$8 sps:$4 sm:$0xff]   ;;  %v2140_v18 = vld [vmem:[%s2271_s1 + $0xc] sm:$0xf] }
  0x1c   : > { %1771 = vmatmul.mubr.msk.bf16.gmra.mrb[4].mxu1 %vm245_vm1, %v1960_v15  ;;  %v889_v51 = vpack.c.bf16 %v867_v46, %v864_v45  ;;  %v837_v59 = vunpack.c.l.bf16 %v1636_v50  ;;  %v838_v60 = vunpack.c.h.bf16 %v1635_v49  ;;  %v869_v62 = vrot.slane %v833_v52, 1  ;;  %v410_v19 = vld [vmem:[%s2072_s27 + $0xc] sm:$0x1]  ;;  %v411_v23 = vld [vmem:[%s2072_s27 + $0x10] ss:$8 sps:$4 sm:$0xff]  }
  0x1d   : > { %1776 = vmatprep.mubr.msk.bf16.mxu1 %vm245_vm1, %v1961_v30  ;;  %1816 = vmatprep.mubr.msk.bf16.mxu0 %vm245_vm1, %v888_v44  ;;  %v871_v63 = vrot.slane %v834_v53, 1  ;;  %v872_v0 = vrot.slane %v835_v54, 1  ;;  %v839_v2 = vunpack.c.l.bf16 %v1638_v55  ;;  %v874_v4 = vrot.slane %v836_v58, 1  ;;  %v412_v24 = vld [vmem:[%s2072_s27 + $0x14] sm:$0x1] }
  0x1e   : > { %v875_v5 = vrot.slane %v837_v59, 1  ;;  %v877_v6 = vrot.slane %v838_v60, 1  ;;  %v870_v8 = vsel %vm455_vm2, %v868_v57, %v869_v62  ;;  %v507_v11 = vsel %vm258_vm0, %v2086_v12, 0  ;;  %v414_v26 = vld [vmem:[%s2072_s27 + $0x1c] sm:$0x1] }
  0x1f   : > { %v873_v9 = vsel %vm455_vm2, %v871_v63, %v872_v0  ;;  %v878_v10 = vrot.slane %v839_v2, 1  ;;  %v423_v20 = vunpack.c.l.bf16 %v407_v16  ;;  %v424_v21 = vunpack.c.l.bf16 %v408_v17  ;;  %v1965_v30 = vld [vmem:[%s2072_s27 + $0x8] ss:$8 sps:$4 sm:$0xff]   ;;  %v416_v44 = vld [vmem:[%s2072_s27 + $0x24] sm:$0x1] }
  0x20   : > { %1817 = vmatmul.mubr.msk.bf16.vlgmr.msra.gmra.mrb[0].mxu0 %vm245_vm1, %v889_v51  ;;  %v890_v13 = vpack.c.bf16 %v873_v9, %v870_v8  ;;  %v876_v14 = vsel %vm455_vm2, %v874_v4, %v875_v5  ;;  %v425_v22 = vunpack.c.h.bf16 %v407_v16  ;;  %v426_v25 = vunpack.c.l.bf16 %v410_v19  ;;  %v1964_v39 = vld [vmem:[%s2072_s27 + $0x30] ss:$8 sps:$4 sm:$0xff]   ;;  %v415_v43 = vld [vmem:[%s2072_s27 + $0x20] ss:$8 sps:$4 sm:$0xff]   ;;  %v418_v45 = vld [vmem:[%s2072_s27 + $0x2c] sm:$0x1] }
  0x21   : > { %1825 = vmatpush3.bf16.msra.mxu0 %v1021_v41  ;;  %v879_v15 = vsel %vm455_vm2, %v877_v6, %v878_v10  ;;  %v427_v27 = vunpack.c.l.bf16 %v411_v23  ;;  %v428_v28 = vunpack.c.l.bf16 %v412_v24  ;;  %v429_v29 = vunpack.c.h.bf16 %v411_v23  ;;  %v419_v49 = vld [vmem:[%s2072_s27 + $0x30] ss:$8 sps:$4 sm:$0xff]   ;;  %v420_v50 = vld [vmem:[%s2072_s27 + $0x34] sm:$0x1]  ;;  %v422_v51 = vld [vmem:[%s2072_s27 + $0x3c] sm:$0x1] }
  0x22   : > { %1928 = vmatprep.subr.msk.bf16.mxu0 %vm258_vm0, %v2123_v61  ;;  %1820 = vmatprep.mubr.msk.bf16.mxu0 %vm245_vm1, %v890_v13  ;;  %v891_v12 = vpack.c.bf16 %v879_v15, %v876_v14  ;;  %v456_v31 = vrot.slane %v423_v20, 1  ;;  %v457_v32 = vrot.slane %v424_v21, 1  ;;  %v459_v33 = vrot.slane %v425_v22, 1  ;;  %v1966_v60 = vld [vmem:[%s2072_s27 + $0x18] ss:$8 sps:$4 sm:$0xff]  }
  0x23   : > { %v430_v34 = vunpack.c.l.bf16 %v414_v26  ;;  %v460_v35 = vrot.slane %v426_v25, 1  ;;  %v462_v36 = vrot.slane %v427_v27, 1  ;;  %v463_v37 = vrot.slane %v428_v28, 1  ;;  %v1967_v4 = vld [vmem:[%s2072_s27 + $0x28] ss:$8 sps:$4 sm:$0xff]  }
  0x24   : > { %1777 = vmatmul.mubr.msk.bf16.vlgmr.msra.gmra.mrb[0].mxu1 %vm245_vm1, %v1962_v56  ;;  %v465_v38 = vrot.slane %v429_v29, 1  ;;  %v458_v40 = vsel %vm455_vm2, %v456_v31, %v457_v32  ;;  %v431_v47 = vunpack.c.l.bf16 %v415_v43  ;;  %v432_v48 = vunpack.c.l.bf16 %v416_v44  ;;  %v1694_v8 = vld [vmem:[%s2271_s1 + $0x20] sm:$0xf]  ;;  %v1969_v19 = vld [vmem:[%s2072_s27 + $0x50] ss:$8 sps:$4 sm:$0xff]  }
  0x25   : > { %1785 = vmatpush3.bf16.msra.mxu1 %v507_v11  ;;  %1780 = vmatprep.mubr.msk.bf16.mxu1 %vm245_vm1, %v1963_v7  ;;  %v466_v41 = vrot.slane %v430_v34, 1  ;;  %v461_v42 = vsel %vm455_vm2, %v459_v33, %v460_v35  ;;  %v464_v52 = vsel %vm455_vm2, %v462_v36, %v463_v37  ;;  %v433_v54 = vunpack.c.h.bf16 %v415_v43  ;;  %v1968_v16 = vld [vmem:[%s2072_s27 + $0x38] ss:$8 sps:$4 sm:$0xff]   ;;  %v1679_v20 = vld [vmem:[%s2072_s27 + $0xc] sm:$0x1] }
  0x26   : > { %1923 = vmatprep.subr.msk.bf16.mxu1 %vm258_vm0, %v2140_v18  ;;  %v488_v46 = vpack.c.bf16 %v461_v42, %v458_v40  ;;  %v434_v55 = vunpack.c.l.bf16 %v418_v45  ;;  %v468_v56 = vrot.slane %v431_v47, 1  ;;  %v469_v57 = vrot.slane %v432_v48, 1  ;;  %v1681_v21 = vld [vmem:[%s2072_s27 + $0x14] sm:$0x1]  ;;  %v1971_v23 = vld [vmem:[%s2072_s27 + $0x90] ss:$8 sps:$4 sm:$0xff]  }
  0x27   : > { %v467_v53 = vsel %vm455_vm2, %v465_v38, %v466_v41  ;;  %v435_v58 = vunpack.c.l.bf16 %v419_v49  ;;  %v436_v59 = vunpack.c.l.bf16 %v420_v50  ;;  %v471_v62 = vrot.slane %v433_v54, 1  ;;  %v1973_v28 = vld [vmem:[%s2072_s27 + $0x70] ss:$8 sps:$4 sm:$0xff]   ;;  %v1685_v31 = vld [vmem:[%s2072_s27 + $0x24] sm:$0x1] }
  0x28   : > { %1821 = vmatmul.mubr.msk.bf16.gmra.mrb[4].mxu0 %vm245_vm1, %v891_v12  ;;  %v472_v63 = vrot.slane %v434_v55, 1  ;;  %v437_v0 = vunpack.c.h.bf16 %v419_v49  ;;  %v438_v2 = vunpack.c.l.bf16 %v422_v51  ;;  %v470_v5 = vsel %vm455_vm2, %v468_v56, %v469_v57  ;;  %v1682_v29 = vld [vmem:[%s2072_s27 + $0x18] ss:$8 sps:$4 sm:$0xff]   ;;  %v1686_v36 = vld [vmem:[%s2072_s27 + $0x28] ss:$8 sps:$4 sm:$0xff]  }
  0x29   : > { %1826 = vmatprep.mubr.msk.bf16.mxu0 %vm245_vm1, %v1965_v30  ;;  %v1134_v6 = vsel %vm258_vm0, %v2123_v61, 0  ;;  %v489_v9 = vpack.c.bf16 %v467_v53, %v464_v52  ;;  %v474_v10 = vrot.slane %v435_v58, 1  ;;  %v475_v11 = vrot.slane %v436_v59, 1  ;;  %v1683_v30 = vld [vmem:[%s2072_s27 + $0x1c] sm:$0x1] }
  0x2a   : > { %v473_v7 = vsel %vm455_vm2, %v471_v62, %v472_v63  ;;  %v477_v14 = vrot.slane %v437_v0, 1  ;;  %v478_v15 = vrot.slane %v438_v2, 1  ;;  %v620_v61 = vsel %vm258_vm0, %v2140_v18, 0  ;;  %v1678_v18 = vld [vmem:[%s2072_s27 + $0x8] ss:$8 sps:$4 sm:$0xff]  }
  0x2b   : > { %v490_v13 = vpack.c.bf16 %v473_v7, %v470_v5  ;;  %v476_v17 = vsel %vm455_vm2, %v474_v10, %v475_v11  ;;  %v1225_v24 = vunpack.c.l.bf16 %v1678_v18  ;;  %v1226_v25 = vunpack.c.l.bf16 %v1679_v20  ;;  %v1687_v38 = vld [vmem:[%s2072_s27 + $0x2c] sm:$0x1]  ;;  %v1972_v40 = vld [vmem:[%s2072_s27 + $0xa0] ss:$8 sps:$4 sm:$0xff]   ;;  %v1975_v43 = vld [vmem:[%s2072_s27 + $0xb0] ss:$8 sps:$4 sm:$0xff]  }
  0x2c   : > { %1781 = vmatmul.mubr.msk.bf16.gmra.mrb[4].mxu1 %vm245_vm1, %v1964_v39  ;;  %v479_v12 = vsel %vm455_vm2, %v477_v14, %v478_v15  ;;  %v1227_v26 = vunpack.c.h.bf16 %v1678_v18  ;;  %v1228_v27 = vunpack.c.l.bf16 %v1681_v21  ;;  %v1308_v37 = vsel %vm258_vm0, %v1694_v8, 0  ;;  %v1689_v39 = vld [vmem:[%s2072_s27 + $0x34] sm:$0x1]  ;;  %v1974_v52 = vld [vmem:[%s2072_s27 + $0x80] ss:$8 sps:$4 sm:$0xff]  }
  0x2d   : > { %1786 = vmatprep.mubr.msk.bf16.mxu1 %vm245_vm1, %v488_v46  ;;  %v491_v22 = vpack.c.bf16 %v479_v12, %v476_v17  ;;  %v1257_v32 = vrot.slane %v1225_v24, 1  ;;  %v1258_v33 = vrot.slane %v1226_v25, 1  ;;  %v1229_v41 = vunpack.c.l.bf16 %v1682_v29  ;;  %v1690_v58 = vld [vmem:[%s2072_s27 + $0x38] ss:$8 sps:$4 sm:$0xff]   ;;  %v1691_v0 = vld [vmem:[%s2072_s27 + $0x3c] sm:$0x1] }
  0x2e   : > { %v1260_v34 = vrot.slane %v1227_v26, 1  ;;  %v1261_v35 = vrot.slane %v1228_v27, 1  ;;  %v1231_v42 = vunpack.c.h.bf16 %v1682_v29  ;;  %v1230_v44 = vunpack.c.l.bf16 %v1683_v30  ;;  %v1693_v2 = vld [vmem:[%s2072_s27 + $0x44] sm:$0x1]  ;;  %v1978_v20 = vld [vmem:[%s2072_s27 + $0x108] ss:$8 sps:$4 sm:$0xff]  }
  0x2f   : > { %v1232_v45 = vunpack.c.l.bf16 %v1685_v31  ;;  %v1233_v46 = vunpack.c.l.bf16 %v1686_v36  ;;  %v1235_v47 = vunpack.c.h.bf16 %v1686_v36  ;;  %v1259_v48 = vsel %vm455_vm2, %v1257_v32, %v1258_v33  ;;  %v1699_v27 = vld [vmem:[%s2272_s2] ss:$0 sm:$0xff] }
  0x30   : > { %1827 = vmatmul.mubr.msk.bf16.vlgmr.msra.gmra.mrb[0].mxu0 %vm245_vm1, %v1966_v60  ;;  %v1262_v49 = vsel %vm455_vm2, %v1260_v34, %v1261_v35  ;;  %v1234_v50 = vunpack.c.l.bf16 %v1687_v38  ;;  %v1236_v51 = vunpack.c.l.bf16 %v1689_v39  ;;  %v1263_v53 = vrot.slane %v1229_v41, 1 }
  0x31   : > { %1835 = vmatpush3.bf16.msra.mxu0 %v1134_v6  ;;  %1830 = vmatprep.mubr.msk.bf16.mxu0 %vm245_vm1, %v1967_v4  ;;  %v1289_v54 = vpack.c.bf16 %v1262_v49, %v1259_v48  ;;  %v1264_v55 = vrot.slane %v1230_v44, 1  ;;  %v1266_v56 = vrot.slane %v1231_v42, 1  ;;  %v1267_v57 = vrot.slane %v1232_v45, 1  ;;  %v1976_v4 = vld [vmem:[%s2072_s27 + $0xc0] ss:$8 sps:$4 sm:$0xff]  }
  0x32   : > { %1929 = vmatprep.subr.msk.bf16.mxu0 %vm258_vm0, %v1694_v8  ;;  %v1269_v59 = vrot.slane %v1233_v46, 1  ;;  %v1270_v60 = vrot.slane %v1234_v50, 1  ;;  %v1272_v62 = vrot.slane %v1235_v47, 1  ;;  %v1273_v63 = vrot.slane %v1236_v51, 1  ;;  %v1977_v6 = vld [vmem:[%s2072_s27 + $0xf8] ss:$8 sps:$4 sm:$0xff]  }
  0x33   : > { %v1265_v5 = vsel %vm455_vm2, %v1263_v53, %v1264_v55  ;;  %v1237_v7 = vunpack.c.l.bf16 %v1690_v58  ;;  %v1238_v8 = vunpack.c.l.bf16 %v1691_v0  ;;  %v1239_v11 = vunpack.c.h.bf16 %v1690_v58 }
  0x34   : > { %1787 = vmatmul.mubr.msk.bf16.vlgmr.msra.gmra.mrb[0].mxu1 %vm245_vm1, %v489_v9  ;;  %v1271_v9 = vsel %vm455_vm2, %v1269_v59, %v1270_v60  ;;  %v1274_v10 = vsel %vm455_vm2, %v1272_v62, %v1273_v63 }
  0x35   : > { %1795 = vmatpush3.bf16.msra.mxu1 %v620_v61  ;;  %1790 = vmatprep.mubr.msk.bf16.mxu1 %vm245_vm1, %v490_v13  ;;  %v1240_v13 = vunpack.c.l.bf16 %v1693_v2  ;;  %v1291_v15 = vpack.c.bf16 %v1274_v10, %v1271_v9  ;;  %v1275_v61 = vrot.slane %v1237_v7, 1  ;;  %v1278_v17 = vrot.slane %v1239_v11, 1 }
  0x36   : > { %1925 = vmatprep.subr.msk.bf16.mxu1 %vm258_vm0, %v2047_v1  ;;  %v1970_v1 = vld [vmem:[%s2072_s27 + $0x60] ss:$8 sps:$4 sm:$0xff]  }
  0x37   : > { %v1279_v12 = vrot.slane %v1240_v13, 1 }
  0x38   : > { %1831 = vmatmul.mubr.msk.bf16.gmra.mrb[4].mxu0 %vm245_vm1, %v1968_v16  ;;  %v1276_v16 = vrot.slane %v1238_v8, 1 }
  0x39   : > { %1836 = vmatprep.mubr.msk.bf16.mxu0 %vm245_vm1, %v1969_v19  ;;  %v1280_v18 = vsel %vm455_vm2, %v1278_v17, %v1279_v12 }
  0x3a   : > { %v1277_v19 = vsel %vm455_vm2, %v1275_v61, %v1276_v16 }
  0x3b   : > { %v1292_v21 = vpack.c.bf16 %v1280_v18, %v1277_v19 }
  0x3c   : > { %1791 = vmatmul.mubr.msk.bf16.gmra.mrb[4].mxu1 %vm245_vm1, %v491_v22 }
  0x3d   : > { %1796 = vmatprep.mubr.msk.bf16.mxu1 %vm245_vm1, %v1971_v23 }
  0x40   : > { %1837 = vmatmul.mubr.msk.bf16.vlgmr.msra.gmra.mrb[0].mxu0 %vm245_vm1, %v1970_v1 }
  0x41   : > { %1845 = vmatpush3.bf16.msra.mxu0 %v1308_v37  ;;  %1840 = vmatprep.mubr.msk.bf16.mxu0 %vm245_vm1, %v1973_v28 }
  0x44   : > { %1797 = vmatmul.mubr.msk.bf16.vlgmr.msra.gmra.mrb[0].mxu1 %vm245_vm1, %v1972_v40 }
  0x45   : > { %1855 = vmatpush3.bf16.msra.mxu1 %v2055_v3  ;;  %1800 = vmatprep.mubr.msk.bf16.mxu1 %vm245_vm1, %v1975_v43  ;;  %v1268_v3 = vsel %vm455_vm2, %v1266_v56, %v1267_v57 }
  0x46   : > { %v1290_v14 = vpack.c.bf16 %v1268_v3, %v1265_v5 }
  0x48   : > { %1841 = vmatmul.mubr.msk.bf16.gmra.mrb[4].mxu0 %vm245_vm1, %v1974_v52 }
  0x49   : > { %1846 = vmatprep.mubr.msk.bf16.mxu0 %vm245_vm1, %v1289_v54 }
  0x4c   : > { %1801 = vmatmul.mubr.msk.bf16.gmra.mrb[4].mxu1 %vm245_vm1, %v1976_v4 }
  0x4d   : > { %1810 = vmatprep.mubr.msk.bf16.mxu1 %vm245_vm1, %v1977_v6 }
  0x50   : > { %1847 = vmatmul.mubr.msk.bf16.vlgmr.msra.gmra.mrb[0].mxu0 %vm245_vm1, %v1290_v14 }
  0x51   : > { %1850 = vmatprep.mubr.msk.bf16.mxu0 %vm245_vm1, %v1291_v15 }
  0x58   : > { %1811 = vmatmul.mubr.msk.bf16.vlgmr.msra.gmra.mrb[4].mxu1 %vm245_vm1, %v1978_v20  ;;  %1851 = vmatmul.mubr.msk.bf16.gmra.mrb[4].mxu0 %vm245_vm1, %v1292_v21 }
 0x117   : > { %v1798_v22 = vpop.f32.mrb[0].mxu1 }
 0x118   : > { %v656_v23 = vpop.f32.mrb[1].mxu1 }
 0x119   : > { %v1799_v24 = vpop.f32.mrb[2].mxu1 }
 0x11a   : > { %v659_v25 = vpop.f32.mrb[3].mxu1 }
 0x123   : > { %v1848_v26 = vpop.f32.mrb[0].mxu0 }
 0x124   : > { %v1856_v1 = vadd.f32 %v1848_v26, %v1798_v22  ;;  %v1344_v28 = vpop.f32.mrb[1].mxu0 }
 0x125   : > { %v1857_v29 = vadd.f32 %v1344_v28, %v656_v23  ;;  %v1849_v30 = vpop.f32.mrb[2].mxu0 }
 0x126   : > { %v1392_v31 = vadd.f32 %v1856_v1, %v1699_v27  ;;  %v1858_v32 = vadd.f32 %v1849_v30, %v1799_v24  ;;  %v1347_v33 = vpop.f32.mrb[3].mxu0 }
 0x127   : > { %v1390_v34 = vadd.f32 %v1857_v29, %v1699_v27  ;;  %v1859_v35 = vadd.f32 %v1347_v33, %v659_v25 }
 0x128   : > { %v1400_v36 = vmax.f32 %v1392_v31, 0.0  ;;  %v1393_v37 = vadd.f32 %v1858_v32, %v1699_v27 }
 0x129   : > { %v1398_v38 = vmax.f32 %v1390_v34, 0.0  ;;  %v1391_v39 = vadd.f32 %v1859_v35, %v1699_v27 }
 0x12a   : > { %v1713_v40 = vpack.c.bf16 %v1400_v36, %v1400_v36  ;;  %v1401_v41 = vmax.f32 %v1393_v37, 0.0 }
 0x12b   : > { %v1812_v42 = vpop.f32.mrb[4].mxu1  ;;  %v1711_v43 = vpack.c.bf16 %v1398_v38, %v1398_v38  ;;  %v1399_v44 = vmax.f32 %v1391_v39, 0.0  ;;  %v1852_v45 = vpop.f32.mrb[4].mxu0 }
 0x12c   : > { %v785_v46 = vpop.f32.mrb[5].mxu1  ;;  %1441 = vst.msk [vmem:[%s2243_s20 + $0x8] sm:$0xf] %vm1438_vm3, %v1713_v40  ;;  %v1714_v47 = vpack.c.bf16 %v1401_v41, %v1401_v41  ;;  %v1860_v48 = vadd.f32 %v1852_v45, %v1812_v42  ;;  %v1360_v49 = vpop.f32.mrb[5].mxu0 }
 0x12d   : > { %v1813_v50 = vpop.f32.mrb[6].mxu1  ;;  %1439 = vst.msk [vmem:[%s2243_s20] sm:$0xf] %vm1438_vm3, %v1711_v43  ;;  %v1712_v51 = vpack.c.bf16 %v1399_v44, %v1399_v44  ;;  %v1861_v52 = vadd.f32 %v1360_v49, %v785_v46  ;;  %v1853_v53 = vpop.f32.mrb[6].mxu0 }
 0x12e   : > { %v788_v54 = vpop.f32.mrb[7].mxu1  ;;  %1442 = vst.msk [vmem:[%s2243_s20 + $0xc] sm:$0xf] %vm1438_vm3, %v1714_v47  ;;  %v1396_v55 = vadd.f32 %v1860_v48, %v1699_v27  ;;  %v1862_v56 = vadd.f32 %v1853_v53, %v1813_v50  ;;  %v1363_v57 = vpop.f32.mrb[7].mxu0 }
 0x12f   : > { %1440 = vst.msk [vmem:[%s2243_s20 + $0x4] sm:$0xf] %vm1438_vm3, %v1712_v51  ;;  %v1394_v58 = vadd.f32 %v1861_v52, %v1699_v27  ;;  %v1863_v59 = vadd.f32 %v1363_v57, %v788_v54 }
 0x130   : > { %v1404_v60 = vmax.f32 %v1396_v55, 0.0  ;;  %v1397_v62 = vadd.f32 %v1862_v56, %v1699_v27 }
 0x131   : > { %v1402_v63 = vmax.f32 %v1394_v58, 0.0  ;;  %v1395_v0 = vadd.f32 %v1863_v59, %v1699_v27 }
 0x132   : > { %v1717_v2 = vpack.c.bf16 %v1404_v60, %v1404_v60  ;;  %v1405_v4 = vmax.f32 %v1397_v62, 0.0 }
 0x133   : > { %v1715_v5 = vpack.c.bf16 %v1402_v63, %v1402_v63  ;;  %v1403_v3 = vmax.f32 %v1395_v0, 0.0 }
 0x134   : > { %1445 = vst.msk [vmem:[%s2243_s20 + $0x18] sm:$0xf] %vm1438_vm3, %v1717_v2  ;;  %v1718_v6 = vpack.c.bf16 %v1405_v4, %v1405_v4 }
 0x135   : > { %1443 = vst.msk [vmem:[%s2243_s20 + $0x10] sm:$0xf] %vm1438_vm3, %v1715_v5  ;;  %v1716_v7 = vpack.c.bf16 %v1403_v3, %v1403_v3 }
 0x136   : > { %1446 = vst.msk [vmem:[%s2243_s20 + $0x1c] sm:$0xf] %vm1438_vm3, %v1718_v6 }
 0x137   : > { %1444 = vst.msk [vmem:[%s2243_s20 + $0x14] sm:$0xf] %vm1438_vm3, %v1716_v7 }
 0x138 PF: > { %s13_s14 = sadd.s32 1, %s2001_s14   ;;  %s2274_s12 = smov %s1997_s13 }
 0x139   : > { %p10_p5 = scmp.ge.s32.totalorder %s13_s14, 4   ;;  %s2275_s13 = smov %s2277_s15 }
 0x13b   :  { %12 = sbr.rel (!%p10_p5) target bundleno = 2 (0x2), region = 76 }

// kernel: basic_block_forward.5
= control target key start
LH: loop header
LB: loop body
LE: loop exit
PB: predicated region body
PF: predicated region fallthrough
CT: control target
= control target key end

     0   :  { %s2158_s15 = smov 0   ;;  %s2160_s16 = smov 0   ;;  %s2647_s0 = inlined_call_operand.vmem [shape: bf16[2,1,1,10,10,8], index: 0, kind: input, shape index: {}]   ;;  %s2648_s1 = inlined_call_operand.vmem [shape: bf16[9,8,8], index: 1, kind: input, shape index: {}]   ;;  %s2649_s2 = inlined_call_operand.vmem [shape: f32[1,8], index: 2, kind: input, shape index: {}]   ;;  %s2650_s3 = inlined_call_operand.vmem [shape: bf16[2,64,8], index: 3, kind: input, shape index: {}]   ;;  %s2651_s4 = inlined_call_operand.vmem [shape: f32[2,64,8], index: 4, kind: output, shape index: {}]  }
   0x1   :  { %s2162_s17 = smov 0  }
   0x2 LB: > { %s26_s18 = sadd.s32 1, %s2127_s16  ;;  %p1711_p0 = scmp.ge.s32.totalorder %s2131_s17, 1  ;;  %s2131_s17 = sphi %s2162_s17, %s14_s17   ;;  %s2127_s16 = sphi %s2160_s16, %s2653_s16   ;;  %s2123_s15 = sphi %s2158_s15, %s2652_s15  }
   0x3   : > { %p28_p1 = scmp.ge.s32.totalorder %s26_s18, 2  ;;  %p193_p2 = scmp.lt.s32.totalorder %s2131_s17, 3 }
   0x5   : > { %s2655_s18 = smov (%p28_p1, %s26_s18), 0  ;;  %p194_p3 = pnand %p1711_p0, %p193_p2 }
   0x6   : > { %v1721_v0 = vld [vmem:[%s2648_s1 + $0x4] sm:$0xf] (!%p194_p3)  ;;  %vm367_vm0 = vcmask (!%p194_p3), 1043456   ;;  %v2182_v1 = vld [vmem:[%s2648_s1 + $0x10] sm:$0xf] (!%p194_p3)  ;;  %p232_p4 = scmp.lt.s32.totalorder (!%p194_p3), %s2123_s15, 1 }
   0x7   : > { %197 = sbr.rel (%p194_p3) target bundleno = 327 (0x147), region = 36  ;;  %2062 = vmatprep.subr.msk.bf16.mxu1 (!%p194_p3), %vm367_vm0, %v1721_v0  ;;  %2066 = vmatprep.subr.msk.bf16.mxu0 (!%p194_p3), %vm367_vm0, %v2182_v1  ;;  %v369_v2 = vsel (!%p194_p3), %vm367_vm0, %v1721_v0, 0  ;;  %v2190_v3 = vsel (!%p194_p3), %vm367_vm0, %v2182_v1, 0  ;;  %v282_v4 = vld [vmem:[%s2648_s1] sm:$0xf] (!%p194_p3)  ;;  %vm315_vm1 = vcmask (!%p194_p3), 1046528  }
   0x8   : > { %1907 = vmatpush3.bf16.msra.mxu1 (!%p194_p3), %v369_v2  ;;  %1947 = vmatpush3.bf16.msra.mxu0 (!%p194_p3), %v2190_v3  ;;  %v1781_v5 = vld [vmem:[%s2648_s1 + $0x14] sm:$0xf] (!%p194_p3)  ;;  %vm354_vm2 = vcmask (!%p194_p3), 64512   ;;  %v2210_v6 = vsel (!%p194_p3), %vm367_vm0, %v282_v4, 0  ;;  %v2215_v7 = vld [vmem:[%s2648_s1 + $0x18] sm:$0xf] (!%p194_p3) }
   0x9   : > { %2063 = vmatprep.subr.msk.bf16.mxu1 (!%p194_p3), %vm367_vm0, %v282_v4  ;;  %2068 = vmatprep.subr.msk.bf16.mxu0 (!%p194_p3), %vm367_vm0, %v1781_v5  ;;  %v2239_v22 = vld [vmem:[%s2648_s1 + $0x8] sm:$0xf] (!%p194_p3)  ;;  %v2247_v27 = vsel (!%p194_p3), %vm367_vm0, %v1781_v5, 0  ;;  %v2256_v32 = vsel (!%p194_p3), %vm367_vm0, %v2215_v7, 0  ;;  %vm540_vm3 = vcmask (!%p194_p3), 1045504  }
   0xa   : > { %v2271_v43 = vsel (!%p194_p3), %vm367_vm0, %v2239_v22, 0 }
   0xe   : > { %s2657_s15 = smov (!%p232_p4, %s2123_s15), 1 }
   0xf   : > { %s2072_s27 = smul.u32 80, %s2657_s15  ;;  %s1840_s19 = sshll.u32 %s2657_s15, 5 }
  0x10   : > { %s245_s22 = scalar_lea.vmem %s2650_s3, %s1840_s19  ;;  %s1841_s25 = sshll.u32 %s2657_s15, 6 }
  0x11   : > { %s2207_s30 = scalar_lea.vmem %s2647_s0, %s2072_s27  ;;  %s2620_s28 = scalar_lea.vmem %s2651_s4, %s1841_s25 }
  0x12   : > { %v2218_v8 = vld [vmem:[%s2207_s30] sm:$0xf]  ;;  %v2221_v9 = vld [vmem:[%s2207_s30 + $0x8] sm:$0xf]  ;;  %v2224_v10 = vld [vmem:[%s2207_s30 + $0x4] sm:$0x1] }
  0x13   : > { %v270_v11 = vunpack.c.l.bf16 %v2218_v8  ;;  %v271_v12 = vunpack.c.l.bf16 %v2221_v9  ;;  %v2229_v13 = vld [vmem:[%s2207_s30 + $0xc] sm:$0x1]  ;;  %v291_v14 = vunpack.c.l.bf16 %v2224_v10  ;;  %v1752_v15 = vld [vmem:[%s2207_s30 + $0x8] ss:$8 sps:$4 sm:$0xff]   ;;  %v1755_v18 = vld [vmem:[%s2207_s30 + $0x14] sm:$0x1]  ;;  %v1717_v47 = vcombine.low %v2218_v8, %v2221_v9 }
  0x14   : > { %v1753_v16 = vld [vmem:[%s2207_s30 + $0xc] sm:$0x1]  ;;  %v292_v17 = vunpack.c.l.bf16 %v2229_v13  ;;  %v797_v19 = vunpack.c.l.bf16 %v1752_v15  ;;  %v799_v21 = vunpack.c.h.bf16 %v1752_v15  ;;  %v2244_v26 = vld [vmem:[%s2207_s30 + $0x10] sm:$0xf]  ;;  %v800_v29 = vunpack.c.l.bf16 %v1755_v18  ;;  %v2252_v31 = vld [vmem:[%s2207_s30 + $0x18] sm:$0xf] }
  0x15   : > { %v798_v20 = vunpack.c.l.bf16 %v1753_v16  ;;  %v316_v23 = vrot.slane %v270_v11, 1  ;;  %v317_v24 = vrot.slane %v291_v14, 1  ;;  %v319_v25 = vrot.slane %v271_v12, 1  ;;  %v2260_v36 = vld [vmem:[%s2207_s30 + $0x14] sm:$0x1] }
  0x16   : > { %v320_v28 = vrot.slane %v292_v17, 1  ;;  %v829_v30 = vrot.slane %v797_v19, 1  ;;  %v832_v35 = vrot.slane %v799_v21, 1  ;;  %v2263_v37 = vld [vmem:[%s2207_s30 + $0x1c] sm:$0x1]  ;;  %v833_v39 = vrot.slane %v800_v29, 1 }
  0x17   : > { %v318_v33 = vsel %vm315_vm1, %v316_v23, %v317_v24  ;;  %v830_v34 = vrot.slane %v798_v20, 1  ;;  %v272_v40 = vunpack.c.l.bf16 %v2244_v26  ;;  %v1756_v41 = vld [vmem:[%s2207_s30 + $0x18] ss:$8 sps:$4 sm:$0xff]   ;;  %v1757_v42 = vld [vmem:[%s2207_s30 + $0x1c] sm:$0x1]  ;;  %v273_v46 = vunpack.c.l.bf16 %v2252_v31 }
  0x18   : > { %v321_v38 = vsel %vm315_vm1, %v319_v25, %v320_v28  ;;  %v834_v48 = vsel %vm315_vm1, %v832_v35, %v833_v39  ;;  %v293_v49 = vunpack.c.l.bf16 %v2260_v36  ;;  %v294_v50 = vunpack.c.l.bf16 %v2263_v37  ;;  %v1759_v52 = vld [vmem:[%s2207_s30 + $0x24] sm:$0x1]  ;;  %v2283_v57 = vld [vmem:[%s2207_s30 + $0x20] sm:$0xf]  ;;  %v2294_v62 = vld [vmem:[%s2207_s30 + $0x28] sm:$0xf] }
  0x19   : > { %v348_v44 = vpack.c.bf16 %v321_v38, %v318_v33  ;;  %v831_v45 = vsel %vm315_vm1, %v829_v30, %v830_v34  ;;  %v322_v51 = vrot.slane %v272_v40, 1  ;;  %v325_v54 = vrot.slane %v273_v46, 1  ;;  %v2298_v5 = vld [vmem:[%s2207_s30 + $0x24] sm:$0x1]  ;;  %v2301_v11 = vld [vmem:[%s2207_s30 + $0x2c] sm:$0x1] }
  0x1a   : > { %v861_v53 = vpack.c.bf16 %v834_v48, %v831_v45  ;;  %v801_v55 = vunpack.c.l.bf16 %v1756_v41  ;;  %v802_v56 = vunpack.c.l.bf16 %v1757_v42  ;;  %v2285_v58 = vrot.slane %v798_v20, 2  ;;  %v2309_v19 = vld [vmem:[%s2207_s30 + $0x30] sm:$0xf]  ;;  %v2312_v20 = vld [vmem:[%s2207_s30 + $0x38] sm:$0xf] }
  0x1b   : > { %1908 = vmatprep.mubr.msk.bf16.mxu1 %vm354_vm2, %v348_v44  ;;  %v2287_v59 = vrot.slane %v800_v29, 2  ;;  %v323_v60 = vrot.slane %v293_v49, 1  ;;  %v326_v61 = vrot.slane %v294_v50, 1  ;;  %v803_v63 = vunpack.c.h.bf16 %v1756_v41  ;;  %v2316_v28 = vld [vmem:[%s2207_s30 + $0x34] sm:$0x1] }
  0x1c   : > { %1948 = vmatprep.mubr.msk.bf16.mxu0 %vm354_vm2, %v861_v53  ;;  %v804_v0 = vunpack.c.l.bf16 %v1759_v52  ;;  %v835_v2 = vrot.slane %v801_v55, 1  ;;  %v836_v4 = vrot.slane %v802_v56, 1  ;;  %v2305_v16 = vrot.slane %v802_v56, 2  ;;  %v2322_v35 = vld [vmem:[%s2207_s30 + $0x3c] sm:$0x1] }
  0x1d   : > { %v324_v12 = vsel %vm315_vm1, %v322_v51, %v323_v60  ;;  %v327_v15 = vsel %vm315_vm1, %v325_v54, %v326_v61  ;;  %v274_v18 = vunpack.c.l.bf16 %v2283_v57  ;;  %v838_v24 = vrot.slane %v803_v63, 1  ;;  %v1773_v38 = vld [vmem:[%s2207_s30 + $0x8] sm:$0xe]  ;;  %v1774_v44 = vld [vmem:[%s2207_s30 + $0x10] sm:$0xe] }
  0x1e   : > { %v349_v21 = vpack.c.bf16 %v327_v15, %v324_v12  ;;  %v837_v23 = vsel %vm315_vm1, %v835_v2, %v836_v4  ;;  %v839_v25 = vrot.slane %v804_v0, 1  ;;  %v989_v29 = vrot.slane %v804_v0, 2  ;;  %v1775_v45 = vld [vmem:[%s2207_s30 + $0x18] sm:$0xe]  ;;  %v1776_v53 = vld [vmem:[%s2207_s30 + $0x20] sm:$0xe] }
  0x1f   : > { %v275_v30 = vunpack.c.l.bf16 %v2294_v62  ;;  %v295_v33 = vunpack.c.l.bf16 %v2298_v5  ;;  %v296_v34 = vunpack.c.l.bf16 %v2301_v11  ;;  %v328_v40 = vrot.slane %v274_v18, 1  ;;  %v2348_v4 = vld [vmem:[%s2207_s30 + $0x34] sm:$0x1]  ;;  %v1803_v36 = vld [vmem:[%s2207_s30 + $0x10] ss:$8 sps:$4 sm:$0xff]  }
  0x20   : > { %1909 = vmatmul.mubr.msk.bf16.vlgmr.msra.gmra.mrb[0].mxu1 %vm354_vm2, %v349_v21  ;;  %v840_v39 = vsel %vm315_vm1, %v838_v24, %v839_v25  ;;  %v276_v41 = vunpack.c.l.bf16 %v2309_v19  ;;  %v277_v42 = vunpack.c.l.bf16 %v2312_v20  ;;  %v297_v54 = vunpack.c.l.bf16 %v2316_v28  ;;  %v1777_v21 = vld [vmem:[%s2207_s30 + $0x28] sm:$0xe]  ;;  %v1832_v28 = vld [vmem:[%s2648_s1 + $0x20] sm:$0xf] }
  0x21   : > { %1917 = vmatpush3.bf16.msra.mxu1 %v2210_v6  ;;  %v862_v46 = vpack.c.bf16 %v840_v39, %v837_v23  ;;  %v329_v48 = vrot.slane %v295_v33, 1  ;;  %v331_v51 = vrot.slane %v275_v30, 1  ;;  %v332_v52 = vrot.slane %v296_v34, 1  ;;  %v2342_v6 = vld [vmem:[%s2207_s30 + $0x2c] sm:$0x1] }
  0x22   : > { %v298_v55 = vunpack.c.l.bf16 %v2322_v35  ;;  %v334_v56 = vrot.slane %v276_v41, 1  ;;  %v337_v60 = vrot.slane %v277_v42, 1  ;;  %2064 = vmatprep.subr.msk.bf16.mxu1 %vm367_vm0, %v2239_v22  ;;  %v963_v0 = vunpack.c.l.bf16 %v1773_v38  ;;  %v2361_v38 = vld [vmem:[%s2207_s30 + $0x3c] sm:$0x1] }
  0x23   : > { %1949 = vmatmul.mubr.msk.bf16.vlgmr.msra.gmra.mrb[0].mxu0 %vm354_vm2, %v862_v46  ;;  %v330_v61 = vsel %vm315_vm1, %v328_v40, %v329_v48  ;;  %v333_v63 = vsel %vm315_vm1, %v331_v51, %v332_v52  ;;  %v964_v2 = vunpack.c.l.bf16 %v1774_v44  ;;  %v335_v22 = vrot.slane %v297_v54, 1  ;;  %v2368_v44 = vld [vmem:[%s2207_s30 + $0x44] sm:$0x1] }
  0x24   : > { %1957 = vmatpush3.bf16.msra.mxu0 %v2247_v27  ;;  %v350_v12 = vpack.c.bf16 %v333_v63, %v330_v61  ;;  %v338_v15 = vrot.slane %v298_v55, 1  ;;  %v965_v18 = vunpack.c.l.bf16 %v1775_v45  ;;  %v979_v23 = vrot.slane %v963_v0, 2  ;;  %v1778_v27 = vld [vmem:[%s2207_s30 + $0x30] sm:$0xe]  ;;  %v1779_v45 = vld [vmem:[%s2207_s30 + $0x38] sm:$0xe] }
  0x25   : > { %v982_v24 = vrot.slane %v964_v2, 2  ;;  %2069 = vmatprep.subr.msk.bf16.mxu0 %vm367_vm0, %v2215_v7  ;;  %v966_v25 = vunpack.c.l.bf16 %v1776_v53  ;;  %v806_v30 = vunpack.c.l.bf16 %v2342_v6  ;;  %v336_v39 = vsel %vm315_vm1, %v334_v56, %v335_v22  ;;  %v1780_v61 = vld [vmem:[%s2207_s30 + $0x40] sm:$0xe] }
  0x26   : > { %1912 = vmatprep.mubr.msk.bf16.mxu1 %vm354_vm2, %v350_v12  ;;  %v339_v40 = vsel %vm315_vm1, %v337_v60, %v338_v15  ;;  %v985_v41 = vrot.slane %v965_v18, 2  ;;  %v808_v42 = vunpack.c.l.bf16 %v2348_v4  ;;  %v981_v46 = vsel %vm540_vm3, %v979_v23, %v2285_v58 }
  0x27   : > { %v351_v7 = vpack.c.bf16 %v339_v40, %v336_v39  ;;  %v984_v48 = vsel %vm540_vm3, %v982_v24, %v2287_v59  ;;  %v988_v51 = vrot.slane %v966_v25, 2  ;;  %v967_v56 = vunpack.c.l.bf16 %v1777_v21  ;;  %v517_v21 = vld [vmem:[%s2207_s30 + $0x8] sm:$0xe]  ;;  %v518_v39 = vld [vmem:[%s2207_s30 + $0x10] sm:$0xe] }
  0x28   : > { %v1011_v52 = vpack.c.bf16 %v984_v48, %v981_v46  ;;  %v987_v53 = vsel %vm540_vm3, %v985_v41, %v2305_v16  ;;  %v968_v60 = vunpack.c.l.bf16 %v1778_v27  ;;  %v992_v58 = vrot.slane %v806_v30, 2  ;;  %v519_v40 = vld [vmem:[%s2207_s30 + $0x18] sm:$0xe]  ;;  %v520_v46 = vld [vmem:[%s2207_s30 + $0x20] sm:$0xe] }
  0x29   : > { %1913 = vmatmul.mubr.msk.bf16.gmra.mrb[4].mxu1 %vm354_vm2, %v351_v7  ;;  %v990_v63 = vsel %vm540_vm3, %v988_v51, %v989_v29  ;;  %v995_v59 = vrot.slane %v808_v42, 2  ;;  %v810_v0 = vunpack.c.l.bf16 %v2361_v38  ;;  %v542_v16 = vrot.slane %v291_v14, 2  ;;  %v516_v14 = vld [vmem:[%s2207_s30] sm:$0xe]  ;;  %v521_v48 = vld [vmem:[%s2207_s30 + $0x28] sm:$0xe] }
  0x2a   : > { %1958 = vmatprep.mubr.msk.bf16.mxu0 %vm354_vm2, %v1011_v52  ;;  %1918 = vmatprep.mubr.msk.bf16.mxu1 %vm354_vm2, %v1717_v47  ;;  %v991_v2 = vrot.slane %v967_v56, 2  ;;  %v994_v29 = vrot.slane %v968_v60, 2  ;;  %v812_v12 = vunpack.c.l.bf16 %v2368_v44  ;;  %v545_v22 = vrot.slane %v292_v17, 2  ;;  %v1819_v17 = vld [vmem:[%s2648_s1 + $0x1c] sm:$0xf] }
  0x2b   : > { %v1012_v15 = vpack.c.bf16 %v990_v63, %v987_v53  ;;  %v969_v18 = vunpack.c.l.bf16 %v1779_v45  ;;  %v970_v10 = vunpack.c.l.bf16 %v1780_v61  ;;  %v998_v9 = vrot.slane %v810_v0, 2 }
  0x2c   : > { %v993_v23 = vsel %vm540_vm3, %v991_v2, %v992_v58  ;;  %v996_v8 = vsel %vm540_vm3, %v994_v29, %v995_v59  ;;  %v1001_v13 = vrot.slane %v812_v12, 2  ;;  %v1718_v47 = vcombine.low %v2244_v26, %v2252_v31  ;;  %v2101_v58 = vld [vmem:[%s2207_s30 + $0x10] ss:$8 sps:$4 sm:$0xff]   ;;  %v2444_v29 = vld [vmem:[%s2207_s30 + $0x1c] sm:$0x1] }
  0x2d   : > { %v1013_v24 = vpack.c.bf16 %v996_v8, %v993_v23  ;;  %v997_v25 = vrot.slane %v969_v18, 2  ;;  %v1000_v27 = vrot.slane %v970_v10, 2  ;;  %v1719_v41 = vcombine.low %v2283_v57, %v2294_v62  ;;  %v2422_v57 = vld [vmem:[%s2648_s1 + $0xc] sm:$0xf]  ;;  %v2102_v8 = vld [vmem:[%s2207_s30 + $0x20] ss:$8 sps:$4 sm:$0xff]  }
  0x2e   : > { %v524_v45 = vunpack.c.l.bf16 %v516_v14  ;;  %v525_v7 = vunpack.c.l.bf16 %v517_v21  ;;  %v527_v62 = vunpack.c.l.bf16 %v519_v40  ;;  %v528_v53 = vunpack.c.l.bf16 %v520_v46  ;;  %v522_v14 = vld [vmem:[%s2207_s30 + $0x30] sm:$0xe] }
  0x2f   : > { %1959 = vmatmul.mubr.msk.bf16.vlgmr.msra.gmra.mrb[0].mxu0 %vm354_vm2, %v1012_v15  ;;  %v999_v26 = vsel %vm540_vm3, %v997_v25, %v998_v9  ;;  %v1002_v31 = vsel %vm540_vm3, %v1000_v27, %v1001_v13  ;;  %v548_v56 = vrot.slane %v293_v49, 2  ;;  %v529_v60 = vunpack.c.l.bf16 %v521_v48  ;;  %v2441_v49 = vld [vmem:[%s2207_s30 + $0x14] sm:$0x1]  ;;  %v1807_v25 = vld [vmem:[%s2207_s30 + $0x20] ss:$8 sps:$4 sm:$0xff]  }
  0x30   : > { %1967 = vmatpush3.bf16.msra.mxu0 %v2256_v32  ;;  %1962 = vmatprep.mubr.msk.bf16.mxu0 %vm354_vm2, %v1013_v24  ;;  %v541_v51 = vrot.slane %v524_v45, 2  ;;  %v544_v52 = vrot.slane %v525_v7, 2  ;;  %v526_v32 = vunpack.c.l.bf16 %v518_v39  ;;  %v551_v61 = vrot.slane %v294_v50, 2  ;;  %v2466_v27 = vld [vmem:[%s2207_s30 + $0x24] sm:$0x1] }
  0x31   : > { %1919 = vmatmul.mubr.msk.bf16.vlgmr.msra.gmra.mrb[0].mxu1 %vm354_vm2, %v1718_v47  ;;  %2070 = vmatprep.subr.msk.bf16.mxu0 %vm367_vm0, %v1819_v17  ;;  %v1014_v63 = vpack.c.bf16 %v1002_v31, %v999_v26  ;;  %v550_v50 = vrot.slane %v527_v62, 2  ;;  %v553_v15 = vrot.slane %v528_v53, 2  ;;  %v557_v10 = vrot.slane %v296_v34, 2  ;;  %v1811_v26 = vld [vmem:[%s2207_s30 + $0x30] ss:$8 sps:$4 sm:$0xff]  }
  0x32   : > { %1927 = vmatpush3.bf16.msra.mxu1 %v2271_v43  ;;  %1922 = vmatprep.mubr.msk.bf16.mxu1 %vm354_vm2, %v1719_v41  ;;  %v543_v59 = vsel %vm540_vm3, %v541_v51, %v542_v16  ;;  %v546_v2 = vsel %vm540_vm3, %v544_v52, %v545_v22  ;;  %v1720_v43 = vcombine.low %v2309_v19, %v2312_v20  ;;  %v547_v37 = vrot.slane %v526_v32, 2  ;;  %v523_v19 = vld [vmem:[%s2207_s30 + $0x38] sm:$0xe]  ;;  %v2472_v41 = vld [vmem:[%s2207_s30 + $0x2c] sm:$0x1] }
  0x33   : > { %2065 = vmatprep.subr.msk.bf16.mxu1 %vm367_vm0, %v2422_v57  ;;  %v554_v16 = vrot.slane %v295_v33, 2  ;;  %v573_v18 = vpack.c.bf16 %v546_v2, %v543_v59  ;;  %v556_v22 = vrot.slane %v529_v60, 2  ;;  %v1235_v20 = vunpack.c.l.bf16 %v1803_v36  ;;  %v2483_v62 = vld [vmem:[%s2207_s30 + $0x34] sm:$0x1]  ;;  %v2486_v53 = vld [vmem:[%s2207_s30 + $0x3c] sm:$0x1] }
  0x34   : > { %v1236_v21 = vunpack.c.l.bf16 %v2441_v49  ;;  %v1237_v5 = vunpack.c.h.bf16 %v1803_v36  ;;  %v1238_v33 = vunpack.c.l.bf16 %v2444_v29  ;;  %v1318_v11 = vsel %vm367_vm0, %v1819_v17, 0  ;;  %v2103_v17 = vld [vmem:[%s2207_s30 + $0x30] ss:$8 sps:$4 sm:$0xff]  }
  0x35   : > { %v549_v34 = vsel %vm540_vm3, %v547_v37, %v548_v56  ;;  %v552_v23 = vsel %vm540_vm3, %v550_v50, %v551_v61  ;;  %v555_v9 = vsel %vm540_vm3, %v553_v15, %v554_v16  ;;  %v558_v13 = vsel %vm540_vm3, %v556_v22, %v557_v10  ;;  %v2104_v10 = vld [vmem:[%s2207_s30 + $0x40] ss:$8 sps:$4 sm:$0xff]  }
  0x36   : > { %v530_v47 = vunpack.c.l.bf16 %v522_v14  ;;  %v531_v24 = vunpack.c.l.bf16 %v523_v19  ;;  %v1267_v39 = vrot.slane %v1235_v20, 1  ;;  %v1268_v40 = vrot.slane %v1236_v21, 1  ;;  %v1815_v20 = vld [vmem:[%s2207_s30 + $0x40] ss:$8 sps:$4 sm:$0xff]  }
  0x37   : > { %1963 = vmatmul.mubr.msk.bf16.gmra.mrb[4].mxu0 %vm354_vm2, %v1014_v63  ;;  %v574_v45 = vpack.c.bf16 %v552_v23, %v549_v34  ;;  %v560_v7 = vrot.slane %v297_v54, 2  ;;  %v1270_v46 = vrot.slane %v1237_v5, 1  ;;  %v1271_v48 = vrot.slane %v1238_v33, 1  ;;  %v2522_v23 = vld [vmem:[%s2207_s30 + $0x44] sm:$0x1] }
  0x38   : > { %1968 = vmatprep.mubr.msk.bf16.mxu0 %vm354_vm2, %v2101_v58  ;;  %v575_v31 = vpack.c.bf16 %v558_v13, %v555_v9  ;;  %v563_v51 = vrot.slane %v298_v55, 2  ;;  %v1239_v52 = vunpack.c.l.bf16 %v1807_v25  ;;  %v1240_v32 = vunpack.c.l.bf16 %v2466_v27  ;;  %v2105_v9 = vld [vmem:[%s2207_s30 + $0x8] ss:$8 sps:$4 sm:$0xff]   ;;  %v2527_v13 = vld [vmem:[%s2207_s30 + $0x4c] sm:$0x1] }
  0x39   : > { %1923 = vmatmul.mubr.msk.bf16.gmra.mrb[4].mxu1 %vm354_vm2, %v1720_v43  ;;  %v559_v56 = vrot.slane %v530_v47, 2  ;;  %v562_v60 = vrot.slane %v531_v24, 2  ;;  %v1241_v54 = vunpack.c.h.bf16 %v1807_v25  ;;  %v1242_v61 = vunpack.c.l.bf16 %v2472_v41 }
  0x3a   : > { %1928 = vmatprep.mubr.msk.bf16.mxu1 %vm354_vm2, %v573_v18  ;;  %v706_v35 = vsel %vm367_vm0, %v2422_v57, 0  ;;  %v1269_v55 = vsel %vm315_vm1, %v1267_v39, %v1268_v40  ;;  %v1243_v63 = vunpack.c.l.bf16 %v1811_v26  ;;  %v1272_v58 = vsel %vm315_vm1, %v1270_v46, %v1271_v48  ;;  %v1760_v18 = vld [vmem:[%s2207_s30 + $0x28] ss:$8 sps:$4 sm:$0xff]   ;;  %v1825_v39 = vld [vmem:[%s2207_s30 + $0x18] sm:$0xe] }
  0x3b   : > { %v1244_v59 = vunpack.c.l.bf16 %v2483_v62  ;;  %v1245_v2 = vunpack.c.h.bf16 %v1811_v26  ;;  %v1246_v36 = vunpack.c.l.bf16 %v2486_v53  ;;  %v1273_v57 = vrot.slane %v1239_v52, 1 }
  0x3c   : > { %v1274_v43 = vrot.slane %v1240_v32, 1  ;;  %v561_v37 = vsel %vm540_vm3, %v559_v56, %v560_v7  ;;  %v564_v50 = vsel %vm540_vm3, %v562_v60, %v563_v51  ;;  %v1276_v15 = vrot.slane %v1241_v54, 1  ;;  %v1764_v7 = vld [vmem:[%s2207_s30 + $0x38] ss:$8 sps:$4 sm:$0xff]  }
  0x3d   : > { %v1277_v16 = vrot.slane %v1242_v61, 1  ;;  %v848_v22 = vrot.slane %v810_v0, 1  ;;  %v1299_v14 = vpack.c.bf16 %v1272_v58, %v1269_v55  ;;  %v1468_v19 = vsel %vm367_vm0, %v1832_v28, 0 }
  0x3e   : > { %v1279_v5 = vrot.slane %v1243_v63, 1  ;;  %v1282_v34 = vrot.slane %v1245_v2, 1  ;;  %v1283_v38 = vrot.slane %v1246_v36, 1  ;;  %v576_v0 = vpack.c.bf16 %v564_v50, %v561_v37  ;;  %v2106_v63 = vld [vmem:[%s2207_s30 + $0x18] ss:$8 sps:$4 sm:$0xff]  }
  0x3f   : > { %1969 = vmatmul.mubr.msk.bf16.vlgmr.msra.gmra.mrb[0].mxu0 %vm354_vm2, %v2102_v8  ;;  %v1275_v8 = vsel %vm315_vm1, %v1273_v57, %v1274_v43  ;;  %v805_v47 = vunpack.c.l.bf16 %v1760_v18  ;;  %v807_v24 = vunpack.c.h.bf16 %v1760_v18  ;;  %v1278_v25 = vsel %vm315_vm1, %v1276_v15, %v1277_v16  ;;  %v1826_v50 = vld [vmem:[%s2207_s30 + $0x20] sm:$0xe] }
  0x40   : > { %1977 = vmatpush3.bf16.msra.mxu0 %v1318_v11  ;;  %1972 = vmatprep.mubr.msk.bf16.mxu0 %vm354_vm2, %v2103_v17  ;;  %v1280_v11 = vrot.slane %v1244_v59, 1  ;;  %v1247_v17 = vunpack.c.l.bf16 %v1815_v20  ;;  %v842_v40 = vrot.slane %v806_v30, 1  ;;  %v1248_v46 = vunpack.c.l.bf16 %v2522_v23 }
  0x41   : > { %1929 = vmatmul.mubr.msk.bf16.vlgmr.msra.gmra.mrb[0].mxu1 %vm354_vm2, %v574_v45  ;;  %2071 = vmatprep.subr.msk.bf16.mxu0 %vm367_vm0, %v1832_v28  ;;  %v845_v45 = vrot.slane %v808_v42, 1  ;;  %v1249_v48 = vunpack.c.h.bf16 %v1815_v20  ;;  %v841_v26 = vrot.slane %v805_v47, 1  ;;  %v1284_v52 = vsel %vm315_vm1, %v1282_v34, %v1283_v38  ;;  %v1829_v34 = vld [vmem:[%s2207_s30 + $0x38] sm:$0xe] }
  0x42   : > { %1937 = vmatpush3.bf16.msra.mxu1 %v706_v35  ;;  %1932 = vmatprep.mubr.msk.bf16.mxu1 %vm354_vm2, %v575_v31  ;;  %v844_v31 = vrot.slane %v807_v24, 1  ;;  %v1281_v51 = vsel %vm315_vm1, %v1279_v5, %v1280_v11  ;;  %v1250_v6 = vunpack.c.l.bf16 %v2527_v13  ;;  %v1402_v4 = vunpack.c.l.bf16 %v1825_v39  ;;  %v2107_v5 = vld [vmem:[%s2207_s30 + $0x28] ss:$8 sps:$4 sm:$0xff]   ;;  %v2108_v47 = vld [vmem:[%s2207_s30 + $0x38] ss:$8 sps:$4 sm:$0xff]  }
  0x43   : > { %2067 = vmatprep.subr.msk.bf16.mxu1 %vm367_vm0, %v2182_v1  ;;  %v1824_v1 = vld [vmem:[%s2207_s30 + $0x10] sm:$0xe]  ;;  %v2545_v42 = vsel %vm315_vm1, %v841_v26, %v842_v40  ;;  %v809_v60 = vunpack.c.l.bf16 %v1764_v7  ;;  %v851_v28 = vrot.slane %v812_v12, 1  ;;  %v1300_v54 = vpack.c.bf16 %v1278_v25, %v1275_v8  ;;  %v1858_v13 = vld [vmem:[%s245_s22 + $0x8] sm:$0xff]  }
  0x44   : > { %v1401_v30 = vunpack.c.l.bf16 %v1824_v1  ;;  %v2548_v56 = vsel %vm315_vm1, %v844_v31, %v845_v45  ;;  %v811_v55 = vunpack.c.h.bf16 %v1764_v7  ;;  %v1285_v58 = vrot.slane %v1247_v17, 1  ;;  %v1828_v11 = vld [vmem:[%s2207_s30 + $0x30] sm:$0xe]  ;;  %v1830_v45 = vld [vmem:[%s2207_s30 + $0x40] sm:$0xe] }
  0x45   : > { %v863_v35 = vpack.c.bf16 %v2548_v56, %v2545_v42  ;;  %v1286_v2 = vrot.slane %v1248_v46, 1  ;;  %v1288_v57 = vrot.slane %v1249_v48, 1  ;;  %v847_v43 = vrot.slane %v809_v60, 1  ;;  %v1831_v31 = vld [vmem:[%s2207_s30 + $0x48] sm:$0xe] }
  0x46   : > { %v1301_v44 = vpack.c.bf16 %v1284_v52, %v1281_v51  ;;  %v1289_v12 = vrot.slane %v1250_v6, 1  ;;  %v1418_v37 = vrot.slane %v1236_v21, 2  ;;  %v850_v15 = vrot.slane %v811_v55, 1  ;;  %v1837_v55 = vld [vmem:[%s2649_s2] ss:$0 sm:$0xff] }
  0x47   : > { %1973 = vmatmul.mubr.msk.bf16.gmra.mrb[4].mxu0 %vm354_vm2, %v2104_v10  ;;  %v1417_v16 = vrot.slane %v1401_v30, 2  ;;  %v1420_v18 = vrot.slane %v1402_v4, 2  ;;  %v1421_v10 = vrot.slane %v1238_v33, 2  ;;  %v849_v20 = vsel %vm315_vm1, %v847_v43, %v848_v22 }
  0x48   : > { %1978 = vmatprep.mubr.msk.bf16.mxu0 %vm354_vm2, %v1299_v14  ;;  %v1827_v14 = vld [vmem:[%s2207_s30 + $0x28] sm:$0xe]  ;;  %v852_v38 = vsel %vm315_vm1, %v850_v15, %v851_v28  ;;  %v1287_v21 = vsel %vm315_vm1, %v1285_v58, %v1286_v2  ;;  %v1290_v29 = vsel %vm315_vm1, %v1288_v57, %v1289_v12  ;;  %v1403_v33 = vunpack.c.l.bf16 %v1826_v50 }
  0x49   : > { %1933 = vmatmul.mubr.msk.bf16.gmra.mrb[4].mxu1 %vm354_vm2, %v576_v0  ;;  %v864_v49 = vpack.c.bf16 %v852_v38, %v849_v20  ;;  %v1404_v0 = vunpack.c.l.bf16 %v1827_v14  ;;  %v1419_v22 = vsel %vm540_vm3, %v1417_v16, %v1418_v37  ;;  %v1422_v8 = vsel %vm540_vm3, %v1420_v18, %v1421_v10  ;;  %v1860_v38 = vld [vmem:[%s245_s22 + $0x18] sm:$0xff]  }
  0x4a   : > { %1938 = vmatprep.mubr.msk.bf16.mxu1 %vm354_vm2, %v2105_v9  ;;  %v1405_v9 = vunpack.c.l.bf16 %v1828_v11  ;;  %v1406_v1 = vunpack.c.l.bf16 %v1829_v34  ;;  %v1424_v24 = vrot.slane %v1240_v32, 2  ;;  %v1449_v25 = vpack.c.bf16 %v1422_v8, %v1419_v22 }
  0x4b   : > { %v1423_v17 = vrot.slane %v1403_v33, 2  ;;  %v1426_v39 = vrot.slane %v1404_v0, 2  ;;  %v1427_v40 = vrot.slane %v1242_v61, 2  ;;  %v1430_v48 = vrot.slane %v1244_v59, 2  ;;  %v1859_v33 = vld [vmem:[%s245_s22 + $0x10] sm:$0xff]  }
  0x4c   : > { %v1429_v7 = vrot.slane %v1405_v9, 2  ;;  %v1432_v26 = vrot.slane %v1406_v1, 2  ;;  %v1407_v41 = vunpack.c.l.bf16 %v1830_v45  ;;  %v1408_v61 = vunpack.c.l.bf16 %v1831_v31 }
  0x4d   : > { %v1425_v27 = vsel %vm540_vm3, %v1423_v17, %v1424_v24  ;;  %v1428_v32 = vsel %vm540_vm3, %v1426_v39, %v1427_v40  ;;  %v1439_v4 = vrot.slane %v1250_v6, 2  ;;  %v1843_v6 = vld [vmem:[%s245_s22] sm:$0xff]   ;;  %v1848_v58 = vunpack.c.l.bf16 %v1858_v13 }
  0x4e   : > { %v1431_v62 = vsel %vm540_vm3, %v1429_v7, %v1430_v48  ;;  %v1450_v53 = vpack.c.bf16 %v1428_v32, %v1425_v27  ;;  %v1435_v52 = vrot.slane %v1407_v41, 2  ;;  %v1438_v30 = vrot.slane %v1408_v61, 2 }
  0x4f   : > { %1979 = vmatmul.mubr.msk.bf16.vlgmr.msra.gmra.mrb[0].mxu0 %vm354_vm2, %v1300_v54  ;;  %v1844_v43 = vunpack.c.l.bf16 %v1843_v6  ;;  %v1849_v50 = vunpack.c.h.bf16 %v1858_v13  ;;  %v1845_v10 = vunpack.c.h.bf16 %v1843_v6  ;;  %v1852_v40 = vunpack.c.l.bf16 %v1859_v33 }
  0x50   : > { %1987 = vmatpush3.bf16.msra.mxu0 %v1468_v19  ;;  %1982 = vmatprep.mubr.msk.bf16.mxu0 %vm354_vm2, %v1301_v44  ;;  %v1302_v19 = vpack.c.bf16 %v1290_v29, %v1287_v21  ;;  %v1440_v56 = vsel %vm540_vm3, %v1438_v30, %v1439_v4  ;;  %v1853_v32 = vunpack.c.h.bf16 %v1859_v33 }
  0x51   : > { %1939 = vmatmul.mubr.msk.bf16.vlgmr.msra.gmra.mrb[0].mxu1 %vm354_vm2, %v2106_v63 }
  0x52   : > { %1997 = vmatpush3.bf16.msra.mxu1 %v2190_v3  ;;  %1942 = vmatprep.mubr.msk.bf16.mxu1 %vm354_vm2, %v2107_v5  ;;  %v1433_v3 = vrot.slane %v1246_v36, 2  ;;  %v1436_v36 = vrot.slane %v1248_v46, 2 }
  0x54   : > { %v1434_v59 = vsel %vm540_vm3, %v1432_v26, %v1433_v3  ;;  %v1437_v42 = vsel %vm540_vm3, %v1435_v52, %v1436_v36  ;;  %v1857_v26 = vunpack.c.h.bf16 %v1860_v38 }
  0x55   : > { %v1451_v51 = vpack.c.bf16 %v1434_v59, %v1431_v62  ;;  %v1452_v60 = vpack.c.bf16 %v1440_v56, %v1437_v42 }
  0x57   : > { %1983 = vmatmul.mubr.msk.bf16.gmra.mrb[4].mxu0 %vm354_vm2, %v1302_v19 }
  0x58   : > { %1988 = vmatprep.mubr.msk.bf16.mxu0 %vm354_vm2, %v1449_v25 }
  0x59   : > { %1943 = vmatmul.mubr.msk.bf16.gmra.mrb[4].mxu1 %vm354_vm2, %v2108_v47  ;;  %v1856_v47 = vunpack.c.l.bf16 %v1860_v38 }
  0x5a   : > { %1952 = vmatprep.mubr.msk.bf16.mxu1 %vm354_vm2, %v863_v35 }
  0x5f   : > { %1989 = vmatmul.mubr.msk.bf16.vlgmr.msra.gmra.mrb[0].mxu0 %vm354_vm2, %v1450_v53 }
  0x60   : > { %1992 = vmatprep.mubr.msk.bf16.mxu0 %vm354_vm2, %v1451_v51 }
  0x65   : > { %1953 = vmatmul.mubr.msk.bf16.vlgmr.msra.gmra.mrb[4].mxu1 %vm354_vm2, %v864_v49 }
  0x67   : > { %1993 = vmatmul.mubr.msk.bf16.gmra.mrb[4].mxu0 %vm354_vm2, %v1452_v60 }
 0x124   : > { %v1940_v23 = vpop.f32.mrb[0].mxu1 }
 0x125   : > { %v742_v46 = vpop.f32.mrb[1].mxu1 }
 0x126   : > { %v1941_v28 = vpop.f32.mrb[2].mxu1 }
 0x127   : > { %v745_v54 = vpop.f32.mrb[3].mxu1 }
 0x132   : > { %v1990_v35 = vpop.f32.mrb[0].mxu0 }
 0x133   : > { %v1998_v63 = vadd.f32 %v1990_v35, %v1940_v23  ;;  %v1504_v2 = vpop.f32.mrb[1].mxu0 }
 0x134   : > { %v1999_v57 = vadd.f32 %v1504_v2, %v742_v46  ;;  %v1991_v44 = vpop.f32.mrb[2].mxu0 }
 0x135   : > { %v1552_v12 = vadd.f32 %v1998_v63, %v1837_v55  ;;  %v2000_v37 = vadd.f32 %v1991_v44, %v1941_v28  ;;  %v1507_v15 = vpop.f32.mrb[3].mxu0 }
 0x136   : > { %v1550_v16 = vadd.f32 %v1999_v57, %v1837_v55  ;;  %v2001_v18 = vadd.f32 %v1507_v15, %v745_v54 }
 0x137   : > { %v1576_v14 = vadd.f32 %v1848_v58, %v1552_v12  ;;  %v1553_v20 = vadd.f32 %v2000_v37, %v1837_v55 }
 0x138   : > { %v1574_v5 = vadd.f32 %v1844_v43, %v1550_v16  ;;  %v1551_v11 = vadd.f32 %v2001_v18, %v1837_v55  ;;  %v1954_v34 = vpop.f32.mrb[4].mxu1 }
 0x139   : > { %v1584_v49 = vmax.f32 %v1576_v14, 0.0  ;;  %v1577_v21 = vadd.f32 %v1849_v50, %v1553_v20  ;;  %v932_v29 = vpop.f32.mrb[5].mxu1 }
 0x13a   : > { %v1582_v0 = vmax.f32 %v1574_v5, 0.0  ;;  %v1575_v22 = vadd.f32 %v1845_v10, %v1551_v11  ;;  %v1994_v8 = vpop.f32.mrb[4].mxu0  ;;  %v1955_v9 = vpop.f32.mrb[6].mxu1 }
 0x13b   : > { %1592 = vst.msk [vmem:[%s2620_s28 + $0x10] sm:$0xff] %vm354_vm2, %v1584_v49  ;;  %v1585_v1 = vmax.f32 %v1577_v21, 0.0  ;;  %v2002_v19 = vadd.f32 %v1994_v8, %v1954_v34  ;;  %v1520_v24 = vpop.f32.mrb[5].mxu0  ;;  %v935_v25 = vpop.f32.mrb[7].mxu1 }
 0x13c   : > { %1590 = vst.msk [vmem:[%s2620_s28] sm:$0xff] %vm354_vm2, %v1582_v0  ;;  %v1583_v17 = vmax.f32 %v1575_v22, 0.0  ;;  %v2003_v39 = vadd.f32 %v1520_v24, %v932_v29  ;;  %v1995_v45 = vpop.f32.mrb[6].mxu0 }
 0x13d   : > { %1593 = vst.msk [vmem:[%s2620_s28 + $0x18] sm:$0xff] %vm354_vm2, %v1585_v1  ;;  %v1556_v7 = vadd.f32 %v2002_v19, %v1837_v55  ;;  %v2004_v48 = vadd.f32 %v1995_v45, %v1955_v9  ;;  %v1523_v3 = vpop.f32.mrb[7].mxu0 }
 0x13e   : > { %1591 = vst.msk [vmem:[%s2620_s28 + $0x8] sm:$0xff] %vm354_vm2, %v1583_v17  ;;  %v1554_v31 = vadd.f32 %v2003_v39, %v1837_v55  ;;  %v2005_v27 = vadd.f32 %v1523_v3, %v935_v25 }
 0x13f   : > { %v1580_v41 = vadd.f32 %v1856_v47, %v1556_v7  ;;  %v1557_v61 = vadd.f32 %v2004_v48, %v1837_v55 }
 0x140   : > { %v1578_v62 = vadd.f32 %v1852_v40, %v1554_v31  ;;  %v1555_v59 = vadd.f32 %v2005_v27, %v1837_v55 }
 0x141   : > { %v1588_v53 = vmax.f32 %v1580_v41, 0.0  ;;  %v1581_v36 = vadd.f32 %v1857_v26, %v1557_v61 }
 0x142   : > { %v1586_v51 = vmax.f32 %v1578_v62, 0.0  ;;  %v1579_v52 = vadd.f32 %v1853_v32, %v1555_v59 }
 0x143   : > { %1596 = vst.msk [vmem:[%s2620_s28 + $0x30] sm:$0xff] %vm354_vm2, %v1588_v53  ;;  %v1589_v30 = vmax.f32 %v1581_v36, 0.0 }
 0x144   : > { %1594 = vst.msk [vmem:[%s2620_s28 + $0x20] sm:$0xff] %vm354_vm2, %v1586_v51  ;;  %v1587_v4 = vmax.f32 %v1579_v52, 0.0 }
 0x145   : > { %1597 = vst.msk [vmem:[%s2620_s28 + $0x38] sm:$0xff] %vm354_vm2, %v1589_v30 }
 0x146   : > { %1595 = vst.msk [vmem:[%s2620_s28 + $0x28] sm:$0xff] %vm354_vm2, %v1587_v4 }
 0x147 PF: > { %s14_s17 = sadd.s32 1, %s2131_s17   ;;  %s2652_s15 = smov %s2127_s16 }
 0x148   : > { %p11_p5 = scmp.ge.s32.totalorder %s14_s17, 4   ;;  %s2653_s16 = smov %s2655_s18 }
 0x14a   :  { %13 = sbr.rel (!%p11_p5) target bundleno = 2 (0x2), region = 80 }

</bundles_post_ra>
